<compile_context>
chip_gen: v7x
topology: tpu7x:2x2x1
jax: 0.10.0
libtpu: 0.0.40
codegen_flags: <defaults>
</compile_context>

<pallas_src>
import functools

import jax
import jax.numpy as jnp
from jax import lax
from jax.experimental import pallas as pl
from jax.experimental.pallas import tpu as pltpu


def _round_up(n, m):
    return ((n + m - 1) // m) * m


def _largest_divisor_leq(n, cap):
    cap = max(1, min(cap, n))
    for d in range(cap, 0, -1):
        if n % d == 0:
            return d
    return 1


def rnn_kernel(x_ref, whx_ref, bh_ref, whh_t_ref, wph_t_ref, bp_ref,
               out_ref, h_ref, *, recurrence_precision):
    # x_ref    : (t_chunk, TB, 1)  time-major inputs for this batch tile
    # whx_ref  : (1, H_pad)        W_hx[:, 0], zero-padded hidden
    # bh_ref   : (1, H_pad)        bias_h[:, 0], zero-padded hidden
    # whh_t_ref: (H_pad, H_pad)    W_hh^T, zero-padded
    # wph_t_ref: (H_pad, C_pad)    W_ph^T, zero-padded classes
    # bp_ref   : (1, C_pad)        bias_p, zero-padded classes
    # out_ref  : (TB, C_pad)
    # h_ref    : (TB, H_pad)       VMEM scratch; hidden state carried across
    #                              the (arbitrary) sequence-chunk grid axis
    t_chunk = x_ref.shape[0]
    tc = pl.program_id(1)

    @pl.when(tc == 0)
    def _():
        h_ref[...] = jnp.zeros_like(h_ref)

    # (1, H_pad) rows: 1 vreg each when H_pad == 128, no spill pressure.
    whx = whx_ref[...]
    bh = bh_ref[...]

    def step(t, h):
        # Input term: (TB,1)*(1,H_pad)+(1,H_pad) broadcast-FMA on the VPU,
        # hidden under the serial MXU chain.
        inp = x_ref[t] * whx + bh
        # Recurrence dot reads W_hh^T straight from VMEM each step (vld slots
        # have plenty of slack under the serial MXU chain).
        rec = jnp.dot(h, whh_t_ref[...],
                      preferred_element_type=jnp.float32,
                      precision=recurrence_precision)
        # TODO(synk): tanh of a (TB, H_pad) tile per step all lands on the
        # single EUP port; if TB*H_pad grows past the per-step MXU time,
        # rebalance TB (or use a VPU polynomial tanh).
        return jnp.tanh(inp + rec)

    h = lax.fori_loop(0, t_chunk, step, h_ref[...],
                      unroll=True if t_chunk <= 16 else 8)
    h_ref[...] = h

    @pl.when(tc == pl.num_programs(1) - 1)
    def _():
        # Final projection once, lane-dense padded class dim (unmasked vst).
        out_ref[...] = (
            jnp.dot(h_ref[...], wph_t_ref[...],
                    preferred_element_type=jnp.float32,
                    precision=lax.Precision.HIGHEST)
            + bp_ref[...]
        )


def vanilla_rnn_forward(x, W_hx, W_hh, W_ph, bias_h, bias_p, *,
                        batch_tile=128, seq_chunk=32,
                        recurrence_precision=lax.Precision.HIGHEST):
    """x: (B, T) float32; params match the PyTorch module's shapes."""
    B, T = x.shape
    H, input_dim = W_hx.shape
    assert input_dim == 1, "reference forward only works for input_dim == 1"
    C = W_ph.shape[0]
    f32 = jnp.float32

    # Batch tile: multiple of 8 sublanes, up to `batch_tile` (128 feeds full
    # MXU rows for real batch sizes); tiny batches only pad to the next 8.
    bt = max(8, min(_round_up(batch_tile, 8), _round_up(B, 8)))
    B_pad = _round_up(B, bt)
    # Lane-dense hidden / class dims (padded units / classes stay exactly 0).
    H_pad = _round_up(H, 128)
    C_pad = _round_up(C, 128)
    # Sequence chunk: largest divisor of T not exceeding seq_chunk, so the
    # streamed x block stays small and the next chunk's DMA overlaps compute.
    t_chunk = _largest_divisor_leq(T, seq_chunk)

    x_f = x.astype(f32)
    if B_pad != B:
        x_f = jnp.pad(x_f, ((0, B_pad - B), (0, 0)))
    # Time-major with batch on sublanes: (T, B_pad, 1).
    x_tbc = x_f.T[:, :, None]

    whx_row = jnp.zeros((1, H_pad), f32).at[0, :H].set(W_hx[:, 0].astype(f32))
    bh_row = jnp.zeros((1, H_pad), f32).at[0, :H].set(bias_h[:, 0].astype(f32))
    whh_t = jnp.zeros((H_pad, H_pad), f32).at[:H, :H].set(W_hh.T.astype(f32))
    wph_t = jnp.zeros((H_pad, C_pad), f32).at[:H, :C].set(W_ph.T.astype(f32))
    bp = jnp.zeros((1, C_pad), f32).at[0, :C].set(bias_p.astype(f32))

    nb = B_pad // bt
    nt = T // t_chunk

    cost = pl.CostEstimate(
        flops=int(2 * B_pad * T * H_pad * H_pad + 2 * B_pad * H_pad * C_pad),
        transcendentals=int(B_pad * T * H_pad),
        bytes_accessed=int(4 * (T * B_pad + 2 * H_pad + H_pad * H_pad
                                + H_pad * C_pad + C_pad + B_pad * C_pad)),
    )

    kernel = functools.partial(rnn_kernel,
                               recurrence_precision=recurrence_precision)

    out = pl.pallas_call(
        kernel,
        out_shape=jax.ShapeDtypeStruct((B_pad, C_pad), f32),
        grid_spec=pltpu.PrefetchScalarGridSpec(
            num_scalar_prefetch=0,
            grid=(nb, nt),
            in_specs=[
                # x chunk: new block per (batch tile, sequence chunk).
                pl.BlockSpec((t_chunk, bt, 1), lambda b, t: (t, b, 0)),
                # Grid-invariant weights: constant index_map -> fetched once.
                # TODO(synk): for very large H, single-buffer these with
                # pipeline_mode=pl.Buffered(1) to halve their VMEM footprint.
                pl.BlockSpec((1, H_pad), lambda b, t: (0, 0)),
                pl.BlockSpec((1, H_pad), lambda b, t: (0, 0)),
                pl.BlockSpec((H_pad, H_pad), lambda b, t: (0, 0)),
                pl.BlockSpec((H_pad, C_pad), lambda b, t: (0, 0)),
                pl.BlockSpec((1, C_pad), lambda b, t: (0, 0)),
            ],
            out_specs=pl.BlockSpec((bt, C_pad), lambda b, t: (b, 0)),
            scratch_shapes=[pltpu.VMEM((bt, H_pad), f32)],
        ),
        compiler_params=pltpu.CompilerParams(
            # Batch tiles are independent (shards across TCs on v7x when
            # nb >= 2); sequence chunks are serial (h carried in scratch).
            dimension_semantics=("parallel", "arbitrary"),
        ),
        cost_estimate=cost,
    )(x_tbc, whx_row, bh_row, whh_t, wph_t, bp)

    return out[:B, :C]


def vanilla_rnn_reference(x, W_hx, W_hh, W_ph, bias_h, bias_p):
    """Pure-JAX replica of the PyTorch loop (native (H, B) layout)."""
    hp = lax.Precision.HIGHEST
    B, T = x.shape
    H = W_hh.shape[0]
    h = jnp.zeros((H, B), jnp.float32)
    p = None
    for t in range(T):
        h = jnp.tanh(
            jnp.matmul(W_hx, x[:, t].reshape(1, -1), precision=hp)
            + jnp.matmul(W_hh, h, precision=hp)
            + bias_h
        )
        p = jnp.matmul(h.T, W_ph.T, precision=hp) + bias_p
    return p


if __name__ == "__main__":
    # Small shapes consistent with the module: seq=8, input_dim=1, hidden=32,
    # classes=10, batch=2.
    seq_length, input_dim, num_hidden, num_classes, batch_size = 8, 1, 32, 10, 2

    key = jax.random.PRNGKey(0)
    k_x, k_hx, k_hh, k_ph, k_bh, k_bp = jax.random.split(key, 6)

    x = jax.random.normal(k_x, (batch_size, seq_length), dtype=jnp.float32)
    W_hx = jax.random.normal(k_hx, (num_hidden, input_dim), dtype=jnp.float32)
    W_hh = jax.random.normal(k_hh, (num_hidden, num_hidden), dtype=jnp.float32)
    W_ph = jax.random.normal(k_ph, (num_classes, num_hidden), dtype=jnp.float32)
    # The module initializes biases to zero; use small non-zero values so the
    # kernel's bias paths are actually exercised by the check.
    bias_h = 0.1 * jax.random.normal(k_bh, (num_hidden, 1), dtype=jnp.float32)
    bias_p = 0.1 * jax.random.normal(k_bp, (num_classes,), dtype=jnp.float32)

    p_kernel = vanilla_rnn_forward(x, W_hx, W_hh, W_ph, bias_h, bias_p)
    jax.block_until_ready(p_kernel)

    p_ref = vanilla_rnn_reference(x, W_hx, W_hh, W_ph, bias_h, bias_p)
    assert p_kernel.shape == (batch_size, num_classes)
    # Both sides run full-precision (HIGHEST) matmuls; 1e-3 absorbs the
    # remaining accumulation-order differences through the 8-step tanh
    # recurrence with N(0,1) weights (|p| ~ 5); real bugs are O(1).
    assert jnp.allclose(p_kernel, p_ref, atol=1e-3, rtol=1e-3), float(
        jnp.max(jnp.abs(p_kernel - p_ref))
    )

    print("KERNEL_OK")
</pallas_src>

<mosaic_0001>
module attributes {stable_mosaic.version = 11 : i64} {
  func.func @rnn_kernel(%arg0: i32, %arg1: i32, %arg2: memref<8x8x1xf32, #tpu.memory_space<vmem>>, %arg3: memref<1x128xf32, #tpu.memory_space<vmem>>, %arg4: memref<1x128xf32, #tpu.memory_space<vmem>>, %arg5: memref<128x128xf32, #tpu.memory_space<vmem>>, %arg6: memref<128x128xf32, #tpu.memory_space<vmem>>, %arg7: memref<1x128xf32, #tpu.memory_space<vmem>>, %arg8: memref<8x128xf32, #tpu.memory_space<vmem>>, %arg9: memref<8x128xf32, #tpu.memory_space<vmem>>) attributes {dimension_semantics = [#tpu.dimension_semantics<parallel>, #tpu.dimension_semantics<arbitrary>], iteration_bounds = array<i64: 1, 1>, scalar_prefetch = 0 : i64, scratch_operands = 1 : i64, tpu.core_type = #tpu.core_type<tc>, window_params = [{transform_indices = @transform_0, window_bounds = array<i64: 8, 8, 1>}, {pipeline_mode = #tpu.pipeline_mode<synchronous>, transform_indices = @transform_1, window_bounds = array<i64: 1, 128>}, {pipeline_mode = #tpu.pipeline_mode<synchronous>, transform_indices = @transform_2, window_bounds = array<i64: 1, 128>}, {pipeline_mode = #tpu.pipeline_mode<synchronous>, transform_indices = @transform_3, window_bounds = array<i64: 128, 128>}, {pipeline_mode = #tpu.pipeline_mode<synchronous>, transform_indices = @transform_4, window_bounds = array<i64: 128, 128>}, {pipeline_mode = #tpu.pipeline_mode<synchronous>, transform_indices = @transform_5, window_bounds = array<i64: 1, 128>}, {transform_indices = @transform_6, window_bounds = array<i64: 8, 128>}]} {
    %c0_i32 = arith.constant 0 : i32
    %0 = arith.cmpi eq, %arg1, %c0_i32 : i32
    %1 = arith.extui %0 : i1 to i32
    %c0_i32_0 = arith.constant 0 : i32
    %2 = arith.cmpi ne, %1, %c0_i32_0 : i32
    scf.if %2 {
      %cst_50 = arith.constant 0.000000e+00 : f32
      %106 = vector.broadcast %cst_50 : f32 to vector<8x128xf32>
      %c0_51 = arith.constant 0 : index
      %c0_52 = arith.constant 0 : index
      %107 = vector.load %arg9[%c0_51, %c0_52] : memref<8x128xf32, #tpu.memory_space<vmem>>, vector<8x128xf32>
      tpu.vector_store %arg9[%c0_51, %c0_52], %106 {strides = array<i32>} : memref<8x128xf32, #tpu.memory_space<vmem>>, vector<8x128xf32>,
    } else {
    }
    %c0 = arith.constant 0 : index
    %c0_1 = arith.constant 0 : index
    %3 = vector.load %arg3[%c0, %c0_1] : memref<1x128xf32, #tpu.memory_space<vmem>>, vector<1x128xf32>
    %c0_2 = arith.constant 0 : index
    %c0_3 = arith.constant 0 : index
    %4 = vector.load %arg4[%c0_2, %c0_3] : memref<1x128xf32, #tpu.memory_space<vmem>>, vector<1x128xf32>
    %c0_4 = arith.constant 0 : index
    %c0_5 = arith.constant 0 : index
    %5 = vector.load %arg9[%c0_4, %c0_5] : memref<8x128xf32, #tpu.memory_space<vmem>>, vector<8x128xf32>
    %c0_i32_6 = arith.constant 0 : i32
    %6 = arith.index_cast %c0_i32_6 : i32 to index
    %c0_7 = arith.constant 0 : index
    %c0_8 = arith.constant 0 : index
    %7 = vector.load %arg2[%6, %c0_7, %c0_8] : memref<8x8x1xf32, #tpu.memory_space<vmem>>, vector<1x8x1xf32>
    %8 = vector.shape_cast %7 : vector<1x8x1xf32> to vector<8x1xf32>
    %9 = vector.broadcast %8 : vector<8x1xf32> to vector<8x128xf32>
    %10 = vector.broadcast %3 : vector<1x128xf32> to vector<8x128xf32>
    %11 = arith.mulf %9, %10 : vector<8x128xf32>
    %12 = vector.broadcast %4 : vector<1x128xf32> to vector<8x128xf32>
    %13 = arith.addf %11, %12 : vector<8x128xf32>
    %c0_9 = arith.constant 0 : index
    %c0_10 = arith.constant 0 : index
    %14 = vector.load %arg5[%c0_9, %c0_10] : memref<128x128xf32, #tpu.memory_space<vmem>>, vector<128x128xf32>
    %cst = arith.constant dense<0.000000e+00> : vector<8x128xf32>
    %15 = tpu.matmul %5, %14, %cst {dimension_numbers = #tpu.dot_dimension_numbers<[1], [0], [0], [1], [0, 0, 1, 1], [], []>, precision = #tpu.contract_precision<fp32>} : vector<8x128xf32>, vector<128x128xf32>, vector<8x128xf32> -> vector<8x128xf32>
    %16 = arith.addf %13, %15 : vector<8x128xf32>
    %17 = math.tanh %16 : vector<8x128xf32>
    %c1_i32 = arith.constant 1 : i32
    %18 = arith.index_cast %c1_i32 : i32 to index
    %c0_11 = arith.constant 0 : index
    %c0_12 = arith.constant 0 : index
    %19 = vector.load %arg2[%18, %c0_11, %c0_12] : memref<8x8x1xf32, #tpu.memory_space<vmem>>, vector<1x8x1xf32>
    %20 = vector.shape_cast %19 : vector<1x8x1xf32> to vector<8x1xf32>
    %21 = vector.broadcast %20 : vector<8x1xf32> to vector<8x128xf32>
    %22 = vector.broadcast %3 : vector<1x128xf32> to vector<8x128xf32>
    %23 = arith.mulf %21, %22 : vector<8x128xf32>
    %24 = vector.broadcast %4 : vector<1x128xf32> to vector<8x128xf32>
    %25 = arith.addf %23, %24 : vector<8x128xf32>
    %c0_13 = arith.constant 0 : index
    %c0_14 = arith.constant 0 : index
    %26 = vector.load %arg5[%c0_13, %c0_14] : memref<128x128xf32, #tpu.memory_space<vmem>>, vector<128x128xf32>
    %cst_15 = arith.constant dense<0.000000e+00> : vector<8x128xf32>
    %27 = tpu.matmul %17, %26, %cst_15 {dimension_numbers = #tpu.dot_dimension_numbers<[1], [0], [0], [1], [0, 0, 1, 1], [], []>, precision = #tpu.contract_precision<fp32>} : vector<8x128xf32>, vector<128x128xf32>, vector<8x128xf32> -> vector<8x128xf32>
    %28 = arith.addf %25, %27 : vector<8x128xf32>
    %29 = math.tanh %28 : vector<8x128xf32>
    %c2_i32 = arith.constant 2 : i32
    %30 = arith.index_cast %c2_i32 : i32 to index
    %c0_16 = arith.constant 0 : index
    %c0_17 = arith.constant 0 : index
    %31 = vector.load %arg2[%30, %c0_16, %c0_17] : memref<8x8x1xf32, #tpu.memory_space<vmem>>, vector<1x8x1xf32>
    %32 = vector.shape_cast %31 : vector<1x8x1xf32> to vector<8x1xf32>
    %33 = vector.broadcast %32 : vector<8x1xf32> to vector<8x128xf32>
    %34 = vector.broadcast %3 : vector<1x128xf32> to vector<8x128xf32>
    %35 = arith.mulf %33, %34 : vector<8x128xf32>
    %36 = vector.broadcast %4 : vector<1x128xf32> to vector<8x128xf32>
    %37 = arith.addf %35, %36 : vector<8x128xf32>
    %c0_18 = arith.constant 0 : index
    %c0_19 = arith.constant 0 : index
    %38 = vector.load %arg5[%c0_18, %c0_19] : memref<128x128xf32, #tpu.memory_space<vmem>>, vector<128x128xf32>
    %cst_20 = arith.constant dense<0.000000e+00> : vector<8x128xf32>
    %39 = tpu.matmul %29, %38, %cst_20 {dimension_numbers = #tpu.dot_dimension_numbers<[1], [0], [0], [1], [0, 0, 1, 1], [], []>, precision = #tpu.contract_precision<fp32>} : vector<8x128xf32>, vector<128x128xf32>, vector<8x128xf32> -> vector<8x128xf32>
    %40 = arith.addf %37, %39 : vector<8x128xf32>
    %41 = math.tanh %40 : vector<8x128xf32>
    %c3_i32 = arith.constant 3 : i32
    %42 = arith.index_cast %c3_i32 : i32 to index
    %c0_21 = arith.constant 0 : index
    %c0_22 = arith.constant 0 : index
    %43 = vector.load %arg2[%42, %c0_21, %c0_22] : memref<8x8x1xf32, #tpu.memory_space<vmem>>, vector<1x8x1xf32>
    %44 = vector.shape_cast %43 : vector<1x8x1xf32> to vector<8x1xf32>
    %45 = vector.broadcast %44 : vector<8x1xf32> to vector<8x128xf32>
    %46 = vector.broadcast %3 : vector<1x128xf32> to vector<8x128xf32>
    %47 = arith.mulf %45, %46 : vector<8x128xf32>
    %48 = vector.broadcast %4 : vector<1x128xf32> to vector<8x128xf32>
    %49 = arith.addf %47, %48 : vector<8x128xf32>
    %c0_23 = arith.constant 0 : index
    %c0_24 = arith.constant 0 : index
    %50 = vector.load %arg5[%c0_23, %c0_24] : memref<128x128xf32, #tpu.memory_space<vmem>>, vector<128x128xf32>
    %cst_25 = arith.constant dense<0.000000e+00> : vector<8x128xf32>
    %51 = tpu.matmul %41, %50, %cst_25 {dimension_numbers = #tpu.dot_dimension_numbers<[1], [0], [0], [1], [0, 0, 1, 1], [], []>, precision = #tpu.contract_precision<fp32>} : vector<8x128xf32>, vector<128x128xf32>, vector<8x128xf32> -> vector<8x128xf32>
    %52 = arith.addf %49, %51 : vector<8x128xf32>
    %53 = math.tanh %52 : vector<8x128xf32>
    %c4_i32 = arith.constant 4 : i32
    %54 = arith.index_cast %c4_i32 : i32 to index
    %c0_26 = arith.constant 0 : index
    %c0_27 = arith.constant 0 : index
    %55 = vector.load %arg2[%54, %c0_26, %c0_27] : memref<8x8x1xf32, #tpu.memory_space<vmem>>, vector<1x8x1xf32>
    %56 = vector.shape_cast %55 : vector<1x8x1xf32> to vector<8x1xf32>
    %57 = vector.broadcast %56 : vector<8x1xf32> to vector<8x128xf32>
    %58 = vector.broadcast %3 : vector<1x128xf32> to vector<8x128xf32>
    %59 = arith.mulf %57, %58 : vector<8x128xf32>
    %60 = vector.broadcast %4 : vector<1x128xf32> to vector<8x128xf32>
    %61 = arith.addf %59, %60 : vector<8x128xf32>
    %c0_28 = arith.constant 0 : index
    %c0_29 = arith.constant 0 : index
    %62 = vector.load %arg5[%c0_28, %c0_29] : memref<128x128xf32, #tpu.memory_space<vmem>>, vector<128x128xf32>
    %cst_30 = arith.constant dense<0.000000e+00> : vector<8x128xf32>
    %63 = tpu.matmul %53, %62, %cst_30 {dimension_numbers = #tpu.dot_dimension_numbers<[1], [0], [0], [1], [0, 0, 1, 1], [], []>, precision = #tpu.contract_precision<fp32>} : vector<8x128xf32>, vector<128x128xf32>, vector<8x128xf32> -> vector<8x128xf32>
    %64 = arith.addf %61, %63 : vector<8x128xf32>
    %65 = math.tanh %64 : vector<8x128xf32>
    %c5_i32 = arith.constant 5 : i32
    %66 = arith.index_cast %c5_i32 : i32 to index
    %c0_31 = arith.constant 0 : index
    %c0_32 = arith.constant 0 : index
    %67 = vector.load %arg2[%66, %c0_31, %c0_32] : memref<8x8x1xf32, #tpu.memory_space<vmem>>, vector<1x8x1xf32>
    %68 = vector.shape_cast %67 : vector<1x8x1xf32> to vector<8x1xf32>
    %69 = vector.broadcast %68 : vector<8x1xf32> to vector<8x128xf32>
    %70 = vector.broadcast %3 : vector<1x128xf32> to vector<8x128xf32>
    %71 = arith.mulf %69, %70 : vector<8x128xf32>
    %72 = vector.broadcast %4 : vector<1x128xf32> to vector<8x128xf32>
    %73 = arith.addf %71, %72 : vector<8x128xf32>
    %c0_33 = arith.constant 0 : index
    %c0_34 = arith.constant 0 : index
    %74 = vector.load %arg5[%c0_33, %c0_34] : memref<128x128xf32, #tpu.memory_space<vmem>>, vector<128x128xf32>
    %cst_35 = arith.constant dense<0.000000e+00> : vector<8x128xf32>
    %75 = tpu.matmul %65, %74, %cst_35 {dimension_numbers = #tpu.dot_dimension_numbers<[1], [0], [0], [1], [0, 0, 1, 1], [], []>, precision = #tpu.contract_precision<fp32>} : vector<8x128xf32>, vector<128x128xf32>, vector<8x128xf32> -> vector<8x128xf32>
    %76 = arith.addf %73, %75 : vector<8x128xf32>
    %77 = math.tanh %76 : vector<8x128xf32>
    %c6_i32 = arith.constant 6 : i32
    %78 = arith.index_cast %c6_i32 : i32 to index
    %c0_36 = arith.constant 0 : index
    %c0_37 = arith.constant 0 : index
    %79 = vector.load %arg2[%78, %c0_36, %c0_37] : memref<8x8x1xf32, #tpu.memory_space<vmem>>, vector<1x8x1xf32>
    %80 = vector.shape_cast %79 : vector<1x8x1xf32> to vector<8x1xf32>
    %81 = vector.broadcast %80 : vector<8x1xf32> to vector<8x128xf32>
    %82 = vector.broadcast %3 : vector<1x128xf32> to vector<8x128xf32>
    %83 = arith.mulf %81, %82 : vector<8x128xf32>
    %84 = vector.broadcast %4 : vector<1x128xf32> to vector<8x128xf32>
    %85 = arith.addf %83, %84 : vector<8x128xf32>
    %c0_38 = arith.constant 0 : index
    %c0_39 = arith.constant 0 : index
    %86 = vector.load %arg5[%c0_38, %c0_39] : memref<128x128xf32, #tpu.memory_space<vmem>>, vector<128x128xf32>
    %cst_40 = arith.constant dense<0.000000e+00> : vector<8x128xf32>
    %87 = tpu.matmul %77, %86, %cst_40 {dimension_numbers = #tpu.dot_dimension_numbers<[1], [0], [0], [1], [0, 0, 1, 1], [], []>, precision = #tpu.contract_precision<fp32>} : vector<8x128xf32>, vector<128x128xf32>, vector<8x128xf32> -> vector<8x128xf32>
    %88 = arith.addf %85, %87 : vector<8x128xf32>
    %89 = math.tanh %88 : vector<8x128xf32>
    %c7_i32 = arith.constant 7 : i32
    %90 = arith.index_cast %c7_i32 : i32 to index
    %c0_41 = arith.constant 0 : index
    %c0_42 = arith.constant 0 : index
    %91 = vector.load %arg2[%90, %c0_41, %c0_42] : memref<8x8x1xf32, #tpu.memory_space<vmem>>, vector<1x8x1xf32>
    %92 = vector.shape_cast %91 : vector<1x8x1xf32> to vector<8x1xf32>
    %93 = vector.broadcast %92 : vector<8x1xf32> to vector<8x128xf32>
    %94 = vector.broadcast %3 : vector<1x128xf32> to vector<8x128xf32>
    %95 = arith.mulf %93, %94 : vector<8x128xf32>
    %96 = vector.broadcast %4 : vector<1x128xf32> to vector<8x128xf32>
    %97 = arith.addf %95, %96 : vector<8x128xf32>
    %c0_43 = arith.constant 0 : index
    %c0_44 = arith.constant 0 : index
    %98 = vector.load %arg5[%c0_43, %c0_44] : memref<128x128xf32, #tpu.memory_space<vmem>>, vector<128x128xf32>
    %cst_45 = arith.constant dense<0.000000e+00> : vector<8x128xf32>
    %99 = tpu.matmul %89, %98, %cst_45 {dimension_numbers = #tpu.dot_dimension_numbers<[1], [0], [0], [1], [0, 0, 1, 1], [], []>, precision = #tpu.contract_precision<fp32>} : vector<8x128xf32>, vector<128x128xf32>, vector<8x128xf32> -> vector<8x128xf32>
    %100 = arith.addf %97, %99 : vector<8x128xf32>
    %101 = math.tanh %100 : vector<8x128xf32>
    %c8_i32 = arith.constant 8 : i32
    %c0_46 = arith.constant 0 : index
    %c0_47 = arith.constant 0 : index
    %102 = vector.load %arg9[%c0_46, %c0_47] : memref<8x128xf32, #tpu.memory_space<vmem>>, vector<8x128xf32>
    tpu.vector_store %arg9[%c0_46, %c0_47], %101 {strides = array<i32>} : memref<8x128xf32, #tpu.memory_space<vmem>>, vector<8x128xf32>,
    %c0_i32_48 = arith.constant 0 : i32
    %103 = arith.cmpi eq, %arg1, %c0_i32_48 : i32
    %104 = arith.extui %103 : i1 to i32
    %c0_i32_49 = arith.constant 0 : i32
    %105 = arith.cmpi ne, %104, %c0_i32_49 : i32
    scf.if %105 {
      %c0_50 = arith.constant 0 : index
      %c0_51 = arith.constant 0 : index
      %106 = vector.load %arg9[%c0_50, %c0_51] : memref<8x128xf32, #tpu.memory_space<vmem>>, vector<8x128xf32>
      %c0_52 = arith.constant 0 : index
      %c0_53 = arith.constant 0 : index
      %107 = vector.load %arg6[%c0_52, %c0_53] : memref<128x128xf32, #tpu.memory_space<vmem>>, vector<128x128xf32>
      %cst_54 = arith.constant dense<0.000000e+00> : vector<8x128xf32>
      %108 = tpu.matmul %106, %107, %cst_54 {dimension_numbers = #tpu.dot_dimension_numbers<[1], [0], [0], [1], [0, 0, 1, 1], [], []>, precision = #tpu.contract_precision<fp32>} : vector<8x128xf32>, vector<128x128xf32>, vector<8x128xf32> -> vector<8x128xf32>
      %c0_55 = arith.constant 0 : index
      %c0_56 = arith.constant 0 : index
      %109 = vector.load %arg7[%c0_55, %c0_56] : memref<1x128xf32, #tpu.memory_space<vmem>>, vector<1x128xf32>
      %110 = vector.broadcast %109 : vector<1x128xf32> to vector<8x128xf32>
      %111 = arith.addf %108, %110 : vector<8x128xf32>
      %c0_57 = arith.constant 0 : index
      %c0_58 = arith.constant 0 : index
      %112 = vector.load %arg8[%c0_57, %c0_58] : memref<8x128xf32, #tpu.memory_space<vmem>>, vector<8x128xf32>
      tpu.vector_store %arg8[%c0_57, %c0_58], %111 {strides = array<i32>} : memref<8x128xf32, #tpu.memory_space<vmem>>, vector<8x128xf32>,
    } else {
    }
    return
  }
  func.func @transform_0(%arg0: i32, %arg1: i32) -> (i32, i32, i32) {
    %c0_i32 = arith.constant 0 : i32
    %c0_i32_0 = arith.constant 0 : i32
    return %arg1, %arg0, %c0_i32 : i32, i32, i32
  }
  func.func @transform_1(%arg0: i32, %arg1: i32) -> (i32, i32) {
    %c0_i32 = arith.constant 0 : i32
    %c0_i32_0 = arith.constant 0 : i32
    %c0_i32_1 = arith.constant 0 : i32
    return %c0_i32, %c0_i32_0 : i32, i32
  }
  func.func @transform_2(%arg0: i32, %arg1: i32) -> (i32, i32) {
    %c0_i32 = arith.constant 0 : i32
    %c0_i32_0 = arith.constant 0 : i32
    %c0_i32_1 = arith.constant 0 : i32
    return %c0_i32, %c0_i32_0 : i32, i32
  }
  func.func @transform_3(%arg0: i32, %arg1: i32) -> (i32, i32) {
    %c0_i32 = arith.constant 0 : i32
    %c0_i32_0 = arith.constant 0 : i32
    %c0_i32_1 = arith.constant 0 : i32
    return %c0_i32, %c0_i32_0 : i32, i32
  }
  func.func @transform_4(%arg0: i32, %arg1: i32) -> (i32, i32) {
    %c0_i32 = arith.constant 0 : i32
    %c0_i32_0 = arith.constant 0 : i32
    %c0_i32_1 = arith.constant 0 : i32
    return %c0_i32, %c0_i32_0 : i32, i32
  }
  func.func @transform_5(%arg0: i32, %arg1: i32) -> (i32, i32) {
    %c0_i32 = arith.constant 0 : i32
    %c0_i32_0 = arith.constant 0 : i32
    %c0_i32_1 = arith.constant 0 : i32
    return %c0_i32, %c0_i32_0 : i32, i32
  }
  func.func @transform_6(%arg0: i32, %arg1: i32) -> (i32, i32) {
    %c0_i32 = arith.constant 0 : i32
    %c0_i32_0 = arith.constant 0 : i32
    return %arg0, %c0_i32 : i32, i32
  }
}

</mosaic_0001>

<bundles_post_ra>
// kernel: tpu_custom_call.1
= control target key start
LH: loop header
LB: loop body
LE: loop exit
PB: predicated region body
PF: predicated region fallthrough
CT: control target
= control target key end

     0   :  { %11 = vsyncpa [#allocation4], 0  ;;  %s11679_s0 = inlined_call_operand.vmem [shape: f32[8,8,1], index: 0, kind: input, shape index: {}]   ;;  %s11680_s1 = inlined_call_operand.vmem [shape: f32[1,128], index: 1, kind: input, shape index: {}]   ;;  %s11681_s2 = inlined_call_operand.vmem [shape: f32[1,128], index: 2, kind: input, shape index: {}]   ;;  %s11682_s3 = inlined_call_operand.hbm [shape: f32[128,128], index: 3, kind: input, shape index: {}]   ;;  %s11683_s4 = inlined_call_operand.hbm [shape: f32[128,128], index: 4, kind: input, shape index: {}]   ;;  %s11684_s5 = inlined_call_operand.vmem [shape: f32[1,128], index: 5, kind: input, shape index: {}]   ;;  %s11685_s6 = inlined_call_operand.hbm [shape: f32[8,128], index: 6, kind: output, shape index: {}]  }
   0x1   :  { %12 = vsyncpa [#allocation7], 0 }
   0x2   :  { %13 = vsyncpa [#allocation5], 0  ;;  %s10215_s21 = smov [#allocation3]   ;;  %s10143_s25 = scalar_lea.hbm %s11682_s3, 2048 }
   0x3   :  { %s25_s22 = sshll.u32 %s10215_s21, 4  ;;  %p10144_p0 = scmp.ne.s32.totalorder %s11682_s3, %s10143_s25  ;;  %s26_s22 = int_to_ptr.vmem [resolvable:$true] %s25_s22 }
   0x4   :  { %p10147_p1 = scmp.lt.u32.totalorder %s10143_s25, %s11682_s3 }
   0x6   :  { %p10149_p2 = pnand %p10147_p1, %p10144_p0 }
   0x8   :  { %10152 = shalt.err (!%p10149_p2)
}
   0x9   :  { %s10153_s30 = scalar_lea.vmem %s26_s22, 2048  ;;  %p10158_p4 = scmp.lt.s32.totalorder %s26_s22, %s26_s22 }
   0xa   :  { %p10154_p3 = scmp.ne.s32.totalorder %s26_s22, %s10153_s30  ;;  %p10159_p5 = scmp.lt.s32.totalorder %s10153_s30, %s10153_s30 }
   0xc   :  { %p10160_p6 = por %p10159_p5, %p10158_p4 }
   0xe   :  { %p10161_p7 = pnand %p10160_p6, %p10154_p3 }
  0x10   :  { %10164 = shalt.err (!%p10161_p7)
}
  0x11   :  { %s10216_s7 = smov 128   ;;  %s10217_s8 = smov 8  }
  0x12   :  { %31 = dma.hbm_to_vmem [thread:$0]  %s11682_s3, 2048, %s26_s22, [#allocation4], %s10216_s7, %s10216_s7, %s10217_s8  }
  0x13   :  { %s10218_s11 = smov [#allocation6]   ;;  %s10165_s15 = scalar_lea.hbm %s11683_s4, 2048 }
  0x14   :  { %s37_s12 = sshll.u32 %s10218_s11, 4  ;;  %p10166_p8 = scmp.ne.s32.totalorder %s11683_s4, %s10165_s15  ;;  %s38_s12 = int_to_ptr.vmem [resolvable:$true] %s37_s12 }
  0x15   :  { %p10169_p9 = scmp.lt.u32.totalorder %s10165_s15, %s11683_s4 }
  0x17   :  { %p10171_p10 = pnand %p10169_p9, %p10166_p8 }
  0x19   :  { %10174 = shalt.err (!%p10171_p10)
}
  0x1a   :  { %s10175_s20 = scalar_lea.vmem %s38_s12, 2048  ;;  %p10180_p12 = scmp.lt.s32.totalorder %s38_s12, %s38_s12 }
  0x1b   :  { %p10176_p11 = scmp.ne.s32.totalorder %s38_s12, %s10175_s20  ;;  %p10181_p13 = scmp.lt.s32.totalorder %s10175_s20, %s10175_s20 }
  0x1d   :  { %p10182_p0 = por %p10181_p13, %p10180_p12 }
  0x1f   :  { %p10183_p1 = pnand %p10182_p0, %p10176_p11 }
  0x21   :  { %10186 = shalt.err (!%p10183_p1)
}
  0x22   :  { %43 = dma.hbm_to_vmem [thread:$0]  %s11683_s4, 2048, %s38_s12, [#allocation7], %s10216_s7, %s10216_s7, %s10217_s8  }
  0x23   :  { %10209 = dma.done.wait [#allocation4], 2048  }
  0x24   :  { %10210 = vsyncadd [#allocation4], 4294965248 }
  0x25   :  { %10211 = dma.done.wait [#allocation7], 2048  }
  0x26   :  { %10212 = vsyncadd [#allocation7], 4294965248  ;;  %v10219_v0 = vmov 0.0|0.0   ;;  %vm10220_vm0 = vmmov 0   ;;  %v10221_v1 = vmov 0.0   ;;  %v80_v2 = vld [vmem:[#allocation3] sm:$0xff] }
  0x27   :  { %8807 = vmatprep.subr.bf16.mxu1 %v10219_v0  ;;  %6949 = vmatprep.mubr.msk.f32.mxu1 %vm10220_vm0, %v10221_v1  ;;  %v81_v3 = vld [vmem:[#allocation3 + $0x8] sm:$0xff]  ;;  %v82_v4 = vld [vmem:[#allocation3 + $0x10] sm:$0xff]  ;;  %v97_v5 = vand.u32 4294901760, %v80_v2  ;;  %v83_v7 = vld [vmem:[#allocation3 + $0x18] sm:$0xff]  ;;  %s10223_s20 = smov [#allocation8]  }
  0x28   :  { %8951 = vmatprep.subr.bf16.mxu0 %v10219_v0  ;;  %7159 = vmatprep.mubr.msk.f32.mxu0 %vm10220_vm0, %v10221_v1  ;;  %v100_v6 = vand.u32 4294901760, %v81_v3  ;;  %v103_v8 = vand.u32 4294901760, %v82_v4  ;;  %v106_v9 = vand.u32 4294901760, %v83_v7  ;;  %v84_v10 = vld [vmem:[#allocation3 + $0x20] sm:$0xff]  ;;  %v85_v11 = vld [vmem:[#allocation3 + $0x28] sm:$0xff]  ;;  %v86_v16 = vld [vmem:[#allocation3 + $0x30] sm:$0xff] }
  0x29   :  { %v109_v14 = vand.u32 4294901760, %v84_v10  ;;  %v112_v15 = vand.u32 4294901760, %v85_v11  ;;  %v87_v17 = vld [vmem:[#allocation3 + $0x38] sm:$0xff]  ;;  %v115_v19 = vand.u32 4294901760, %v86_v16  ;;  %v88_v21 = vld [vmem:[#allocation3 + $0x40] sm:$0xff]  ;;  %v89_v22 = vld [vmem:[#allocation3 + $0x48] sm:$0xff]  ;;  %v10309_v38 = vsub.f32 %v80_v2, %v97_v5 }
  0x2a   :  { %v10289_v12 = vpack.c.bf16 %v100_v6, %v97_v5  ;;  %v10292_v13 = vpack.c.bf16 %v106_v9, %v103_v8  ;;  %v118_v20 = vand.u32 4294901760, %v87_v17  ;;  %v90_v23 = vld [vmem:[#allocation3 + $0x50] sm:$0xff]  ;;  %v91_v24 = vld [vmem:[#allocation3 + $0x58] sm:$0xff]  ;;  %v92_v25 = vld [vmem:[#allocation3 + $0x60] sm:$0xff]  ;;  %v121_v29 = vand.u32 4294901760, %v88_v21  ;;  %s5979_s3 = sshll.u32 %s10223_s20, 4  ;;  %s5980_s3 = int_to_ptr.vmem [resolvable:$true] %s5979_s3 }
  0x2b   :  { %v10298_v18 = vpack.c.bf16 %v112_v15, %v109_v14  ;;  %v93_v26 = vld [vmem:[#allocation3 + $0x68] sm:$0xff]  ;;  %v94_v27 = vld [vmem:[#allocation3 + $0x70] sm:$0xff]  ;;  %v95_v28 = vld [vmem:[#allocation3 + $0x78] sm:$0xff]  ;;  %v124_v31 = vand.u32 4294901760, %v89_v22  ;;  %v127_v32 = vand.u32 4294901760, %v90_v23  ;;  %v130_v33 = vand.u32 4294901760, %v91_v24  ;;  %p10192_p3 = scmp.lt.s32.totalorder %s5980_s3, %s5980_s3 }
  0x2c   :  { %8809 = vmatpush3.bf16.msra.mxu1 %v10289_v12  ;;  %8953 = vmatpush3.bf16.msra.mxu0 %v10289_v12  ;;  %v10304_v30 = vpack.c.bf16 %v118_v20, %v115_v19  ;;  %v133_v34 = vand.u32 4294901760, %v92_v25  ;;  %v136_v35 = vand.u32 4294901760, %v93_v26  ;;  %v139_v36 = vand.u32 4294901760, %v94_v27  ;;  %s10187_s21 = scalar_lea.vmem %s5980_s3, 128 }
  0x2d   :  { %8810 = vmatprep.subr.bf16.mxu1 %v10219_v0  ;;  %8954 = vmatprep.subr.bf16.mxu0 %v10219_v0  ;;  %v142_v37 = vand.u32 4294901760, %v95_v28  ;;  %v10311_v39 = vsub.f32 %v81_v3, %v100_v6  ;;  %v10313_v40 = vsub.f32 %v82_v4, %v103_v8  ;;  %v10316_v41 = vpack.c.bf16 %v124_v31, %v121_v29  ;;  %p10188_p2 = scmp.ne.s32.totalorder %s5980_s3, %s10187_s21  ;;  %p10193_p4 = scmp.lt.s32.totalorder %s10187_s21, %s10187_s21 }
  0x2e   :  { %v10320_v42 = vpack.c.bf16 %v130_v33, %v127_v32  ;;  %v10322_v43 = vpack.c.bf16 %v136_v35, %v133_v34  ;;  %v190_v45 = vand.u32 4294901760, %v10309_v38  ;;  %v10329_v47 = vsub.f32 %v83_v7, %v106_v9 }
  0x2f   :  { %v10324_v44 = vpack.c.bf16 %v142_v37, %v139_v36  ;;  %v197_v46 = vand.u32 4294901760, %v10311_v39  ;;  %v10331_v48 = vsub.f32 %v84_v10, %v109_v14  ;;  %v204_v49 = vand.u32 4294901760, %v10313_v40  ;;  %p10194_p5 = por %p10193_p4, %p10192_p3 }
  0x30   :  { %8812 = vmatpush3.bf16.msra.mxu1 %v10292_v13  ;;  %8956 = vmatpush3.bf16.msra.mxu0 %v10292_v13  ;;  %v10334_v50 = vsub.f32 %v85_v11, %v112_v15  ;;  %v10336_v51 = vsub.f32 %v86_v16, %v115_v19  ;;  %v10338_v52 = vsub.f32 %v87_v17, %v118_v20  ;;  %v211_v60 = vand.u32 4294901760, %v10329_v47 }
  0x31   :  { %8813 = vmatprep.subr.bf16.mxu1 %v10219_v0  ;;  %8957 = vmatprep.subr.bf16.mxu0 %v10219_v0  ;;  %v10341_v53 = vsub.f32 %v88_v21, %v121_v29  ;;  %v10343_v54 = vsub.f32 %v89_v22, %v124_v31  ;;  %v10345_v55 = vsub.f32 %v90_v23, %v127_v32  ;;  %v218_v61 = vand.u32 4294901760, %v10331_v48  ;;  %p10195_p6 = pnand %p10194_p5, %p10188_p2 }
  0x32   :  { %v10349_v56 = vsub.f32 %v91_v24, %v130_v33  ;;  %v10351_v57 = vsub.f32 %v92_v25, %v133_v34  ;;  %v10353_v58 = vsub.f32 %v93_v26, %v136_v35  ;;  %v191_v59 = vsub.f32 %v10309_v38, %v190_v45 }
  0x33   :  { %v10359_v62 = vsub.f32 %v94_v27, %v139_v36  ;;  %v198_v63 = vsub.f32 %v10311_v39, %v197_v46  ;;  %v205_v2 = vsub.f32 %v10313_v40, %v204_v49  ;;  %v225_v3 = vand.u32 4294901760, %v10334_v50 }
  0x34   :  { %8815 = vmatpush3.bf16.msra.mxu1 %v10298_v18  ;;  %8959 = vmatpush3.bf16.msra.mxu0 %v10298_v18  ;;  %v10364_v4 = vsub.f32 %v95_v28, %v142_v37  ;;  %v232_v5 = vand.u32 4294901760, %v10336_v51  ;;  %v239_v6 = vand.u32 4294901760, %v10338_v52  ;;  %v246_v7 = vand.u32 4294901760, %v10341_v53 }
  0x35   :  { %8816 = vmatprep.subr.bf16.mxu1 %v10219_v0  ;;  %8960 = vmatprep.subr.bf16.mxu0 %v10219_v0  ;;  %v253_v8 = vand.u32 4294901760, %v10343_v54  ;;  %v260_v9 = vand.u32 4294901760, %v10345_v55  ;;  %v267_v10 = vand.u32 4294901760, %v10349_v56  ;;  %v274_v11 = vand.u32 4294901760, %v10351_v57 }
  0x36   :  { %v281_v14 = vand.u32 4294901760, %v10353_v58  ;;  %v288_v15 = vand.u32 4294901760, %v10359_v62  ;;  %v10379_v16 = vpack.c.bf16 %v197_v46, %v190_v45  ;;  %v10381_v17 = vpack.c.bf16 %v211_v60, %v204_v49 }
  0x37   :  { %v10383_v19 = vpack.c.bf16 %v225_v3, %v218_v61  ;;  %v295_v20 = vand.u32 4294901760, %v10364_v4  ;;  %v10386_v21 = vpack.c.bf16 %v239_v6, %v232_v5  ;;  %v10388_v22 = vpack.c.bf16 %v253_v8, %v246_v7 }
  0x38   :  { %8818 = vmatpush3.bf16.msra.mxu1 %v10304_v30  ;;  %8962 = vmatpush3.bf16.msra.mxu0 %v10304_v30  ;;  %v10390_v23 = vpack.c.bf16 %v267_v10, %v260_v9  ;;  %v192_v24 = vand.u32 4294901760, %v191_v59  ;;  %v199_v25 = vand.u32 4294901760, %v198_v63  ;;  %v212_v26 = vsub.f32 %v10329_v47, %v211_v60 }
  0x39   :  { %8819 = vmatprep.subr.bf16.mxu1 %v10219_v0  ;;  %8963 = vmatprep.subr.bf16.mxu0 %v10219_v0  ;;  %v10394_v27 = vpack.c.bf16 %v281_v14, %v274_v11  ;;  %v10398_v28 = vpack.c.bf16 %v295_v20, %v288_v15  ;;  %v219_v29 = vsub.f32 %v10331_v48, %v218_v61  ;;  %v206_v32 = vand.u32 4294901760, %v205_v2 }
  0x3a   :  { %v10403_v31 = vpack.c.bf16 %v199_v25, %v192_v24  ;;  %v213_v33 = vand.u32 4294901760, %v212_v26  ;;  %v226_v34 = vsub.f32 %v10334_v50, %v225_v3  ;;  %v233_v35 = vsub.f32 %v10336_v51, %v232_v5 }
  0x3b   :  { %v240_v36 = vsub.f32 %v10338_v52, %v239_v6  ;;  %v220_v45 = vand.u32 4294901760, %v219_v29  ;;  %v247_v61 = vsub.f32 %v10341_v53, %v246_v7  ;;  %v254_v63 = vsub.f32 %v10343_v54, %v253_v8 }
  0x3c   :  { %8821 = vmatpush3.bf16.msra.mxu1 %v10316_v41  ;;  %8965 = vmatpush3.bf16.msra.mxu0 %v10316_v41  ;;  %v10413_v37 = vpack.c.bf16 %v213_v33, %v206_v32  ;;  %v227_v46 = vand.u32 4294901760, %v226_v34  ;;  %v234_v49 = vand.u32 4294901760, %v233_v35  ;;  %v261_v6 = vsub.f32 %v10345_v55, %v260_v9 }
  0x3d   :  { %8822 = vmatprep.subr.bf16.mxu1 %v10219_v0  ;;  %8966 = vmatprep.subr.bf16.mxu0 %v10219_v0  ;;  %v241_v59 = vand.u32 4294901760, %v240_v36  ;;  %v248_v3 = vand.u32 4294901760, %v247_v61  ;;  %v255_v5 = vand.u32 4294901760, %v254_v63  ;;  %v268_v24 = vsub.f32 %v10349_v56, %v267_v10 }
  0x3e   :  { %v10419_v60 = vpack.c.bf16 %v227_v46, %v220_v45  ;;  %v275_v25 = vsub.f32 %v10351_v57, %v274_v11  ;;  %v262_v8 = vand.u32 4294901760, %v261_v6  ;;  %v282_v29 = vsub.f32 %v10353_v58, %v281_v14 }
  0x3f   :  { %v10424_v2 = vpack.c.bf16 %v241_v59, %v234_v49  ;;  %v10432_v7 = vpack.c.bf16 %v255_v5, %v248_v3  ;;  %v269_v26 = vand.u32 4294901760, %v268_v24  ;;  %v289_v33 = vsub.f32 %v10359_v62, %v288_v15  ;;  %v10594_v24 = vld [vmem:[%s11680_s1] ss:$0 sm:$0xff] }
  0x40   :  { %8824 = vmatpush3.bf16.msra.mxu1 %v10320_v42  ;;  %8968 = vmatpush3.bf16.msra.mxu0 %v10320_v42  ;;  %v276_v32 = vand.u32 4294901760, %v275_v25  ;;  %v283_v10 = vand.u32 4294901760, %v282_v29  ;;  %v296_v11 = vsub.f32 %v10364_v4, %v295_v20  ;;  %v10453_v15 = vpack.c.bf16 %v10311_v39, %v10309_v38 }
  0x41   :  { %8825 = vmatprep.subr.bf16.mxu1 %v10219_v0  ;;  %8969 = vmatprep.subr.bf16.mxu0 %v10219_v0  ;;  %v10437_v9 = vpack.c.bf16 %v269_v26, %v262_v8  ;;  %v290_v35 = vand.u32 4294901760, %v289_v33  ;;  %v10460_v20 = vpack.c.bf16 %v10329_v47, %v10313_v40  ;;  %v10468_v38 = vpack.c.bf16 %v10334_v50, %v10331_v48  ;;  %v10600_v26 = vld [vmem:[%s11681_s2] ss:$0 sm:$0xff] }
  0x42   :  { %v10443_v34 = vpack.c.bf16 %v283_v10, %v276_v32  ;;  %v297_v14 = vand.u32 4294901760, %v296_v11  ;;  %v10474_v39 = vpack.c.bf16 %v10338_v52, %v10336_v51  ;;  %v10480_v40 = vpack.c.bf16 %v10343_v54, %v10341_v53  ;;  %v60_v51 = vld [vmem:[%s11679_s0] sm:$0xff]  ;;  %v5991_v53 = vld [vmem:[%s11679_s0 + $0x8] sm:$0xff] }
  0x43   :  { %v10486_v47 = vpack.c.bf16 %v10349_v56, %v10345_v55  ;;  %v10492_v48 = vpack.c.bf16 %v10353_v58, %v10351_v57  ;;  %v10498_v50 = vpack.c.bf16 %v10364_v4, %v10359_v62  ;;  %v10222_v52 = vmov 0   ;;  %v5994_v54 = vld [vmem:[%s11679_s0 + $0x20] sm:$0xff]  ;;  %v5996_v55 = vld [vmem:[%s11679_s0 + $0x30] sm:$0xff] }
  0x44   :  { %8827 = vmatpush3.bf16.msra.mxu1 %v10322_v43  ;;  %8971 = vmatpush3.bf16.msra.mxu0 %v10322_v43  ;;  %v10447_v36 = vpack.c.bf16 %v297_v14, %v290_v35 }
  0x45   :  { %8828 = vmatprep.subr.bf16.mxu1 %v10219_v0  ;;  %8972 = vmatprep.subr.bf16.mxu0 %v10219_v0 }
  0x46   :  { %10123 = vset.pattern.permute.xlu0 %v10222_v52  ;;  %10124 = vset.pattern.permute.xlu1 %v10222_v52 }
  0x47   :  { %63 = vperm.xlu0 %10123, %v60_v51  }
  0x48   :  { %8830 = vmatpush3.bf16.msra.mxu1 %v10324_v44  ;;  %8974 = vmatpush3.bf16.msra.mxu0 %v10324_v44 }
  0x49   :  { %8831 = vmatprep.subr.bf16.mxu1 %v10219_v0  ;;  %8999 = vmatprep.subr.bf16.mxu0 %v10219_v0 }
  0x4b   :  { %6950 = vmatmul.mubr.f32.vlgmr.msra.gmra.mrb[0].mxu1 %v10221_v1  ;;  %743 = vperm.xlu0 %10123, %v5991_v53  }
  0x4c   :  { %8833 = vmatpush3.bf16.msra.mxu1 %v10403_v31  ;;  %6984 = vmatprep.mubr.msk.f32.mxu1 %vm10220_vm0, %v10221_v1 }
  0x4d   :  { %8834 = vmatprep.subr.bf16.mxu1 %v10219_v0 }
  0x4f   :  { %2699 = vperm.xlu0 %10123, %v5994_v54  }
  0x50   :  { %8836 = vmatpush3.bf16.msra.mxu1 %v10413_v37 }
  0x51   :  { %8837 = vmatprep.subr.bf16.mxu1 %v10219_v0 }
  0x53   :  { %4003 = vperm.xlu0 %10123, %v5996_v55  }
  0x54   :  { %8839 = vmatpush3.bf16.msra.mxu1 %v10419_v60 }
  0x55   :  { %8840 = vmatprep.subr.bf16.mxu1 %v10219_v0 }
  0x58   :  { %8842 = vmatpush3.bf16.msra.mxu1 %v10424_v2 }
  0x59   :  { %8843 = vmatprep.subr.bf16.mxu1 %v10219_v0 }
  0x5c   :  { %8845 = vmatpush3.bf16.msra.mxu1 %v10432_v7 }
  0x5d   :  { %8846 = vmatprep.subr.bf16.mxu1 %v10219_v0 }
  0x60   :  { %8848 = vmatpush3.bf16.msra.mxu1 %v10437_v9 }
  0x61   :  { %8849 = vmatprep.subr.bf16.mxu1 %v10219_v0 }
  0x64   :  { %8851 = vmatpush3.bf16.msra.mxu1 %v10443_v34 }
  0x65   :  { %8852 = vmatprep.subr.bf16.mxu1 %v10219_v0 }
  0x68   :  { %8854 = vmatpush3.bf16.msra.mxu1 %v10447_v36 }
  0x69   :  { %8855 = vmatprep.subr.bf16.mxu1 %v10219_v0 }
  0x6b   :  { %6985 = vmatmul.mubr.f32.vlgmr.msra.gmra.mrb[2].mxu1 %v10221_v1 }
  0x6c   :  { %8857 = vmatpush3.bf16.msra.mxu1 %v10453_v15  ;;  %7019 = vmatprep.mubr.msk.f32.mxu1 %vm10220_vm0, %v10221_v1 }
  0x6d   :  { %8858 = vmatprep.subr.bf16.mxu1 %v10219_v0 }
  0x70   :  { %8860 = vmatpush3.bf16.msra.mxu1 %v10460_v20 }
  0x71   :  { %8861 = vmatprep.subr.bf16.mxu1 %v10219_v0 }
  0x74   :  { %8863 = vmatpush3.bf16.msra.mxu1 %v10468_v38 }
  0x75   :  { %8864 = vmatprep.subr.bf16.mxu1 %v10219_v0 }
  0x78   :  { %8866 = vmatpush3.bf16.msra.mxu1 %v10474_v39 }
  0x79   :  { %8867 = vmatprep.subr.bf16.mxu1 %v10219_v0 }
  0x7c   :  { %8869 = vmatpush3.bf16.msra.mxu1 %v10480_v40 }
  0x7d   :  { %8870 = vmatprep.subr.bf16.mxu1 %v10219_v0 }
  0x80   :  { %8872 = vmatpush3.bf16.msra.mxu1 %v10486_v47 }
  0x81   :  { %8873 = vmatprep.subr.bf16.mxu1 %v10219_v0 }
  0x84   :  { %8875 = vmatpush3.bf16.msra.mxu1 %v10492_v48 }
  0x85   :  { %8876 = vmatprep.subr.bf16.mxu1 %v10219_v0 }
  0x88   :  { %8878 = vmatpush3.bf16.msra.mxu1 %v10498_v50 }
  0x89   :  { %8879 = vmatprep.subr.bf16.mxu1 %v10219_v0 }
  0x8b   :  { %7020 = vmatmul.mubr.f32.vlgmr.msra.gmra.mrb[4].mxu1 %v10221_v1 }
  0x8c   :  { %8881 = vmatpush3.bf16.msra.mxu1 %v10289_v12  ;;  %7054 = vmatprep.mubr.msk.f32.mxu1 %vm10220_vm0, %v10221_v1 }
  0x8d   :  { %8882 = vmatprep.subr.bf16.mxu1 %v10219_v0 }
  0x90   :  { %8884 = vmatpush3.bf16.msra.mxu1 %v10292_v13 }
  0x91   :  { %8885 = vmatprep.subr.bf16.mxu1 %v10219_v0 }
  0x94   :  { %8887 = vmatpush3.bf16.msra.mxu1 %v10298_v18 }
  0x95   :  { %8888 = vmatprep.subr.bf16.mxu1 %v10219_v0 }
  0x98   :  { %8890 = vmatpush3.bf16.msra.mxu1 %v10304_v30 }
  0x99   :  { %8891 = vmatprep.subr.bf16.mxu1 %v10219_v0 }
  0x9c   :  { %8893 = vmatpush3.bf16.msra.mxu1 %v10316_v41 }
  0x9d   :  { %8894 = vmatprep.subr.bf16.mxu1 %v10219_v0 }
  0xa0   :  { %8896 = vmatpush3.bf16.msra.mxu1 %v10320_v42 }
  0xa1   :  { %8897 = vmatprep.subr.bf16.mxu1 %v10219_v0 }
  0xa4   :  { %8899 = vmatpush3.bf16.msra.mxu1 %v10322_v43 }
  0xa5   :  { %8900 = vmatprep.subr.bf16.mxu1 %v10219_v0 }
  0xa8   :  { %8902 = vmatpush3.bf16.msra.mxu1 %v10324_v44 }
  0xa9   :  { %8903 = vmatprep.subr.bf16.mxu1 %v10219_v0 }
  0xab   :  { %7055 = vmatmul.mubr.f32.vlgmr.msra.gmra.mrb[6].mxu1 %v10221_v1 }
  0xac   :  { %8905 = vmatpush3.bf16.msra.mxu1 %v10379_v16  ;;  %7089 = vmatprep.mubr.msk.f32.mxu1 %vm10220_vm0, %v10221_v1 }
  0xad   :  { %8906 = vmatprep.subr.bf16.mxu1 %v10219_v0 }
  0xb0   :  { %8908 = vmatpush3.bf16.msra.mxu1 %v10381_v17 }
  0xb1   :  { %8909 = vmatprep.subr.bf16.mxu1 %v10219_v0 }
  0xb4   :  { %8911 = vmatpush3.bf16.msra.mxu1 %v10383_v19 }
  0xb5   :  { %8912 = vmatprep.subr.bf16.mxu1 %v10219_v0 }
  0xb8   :  { %8914 = vmatpush3.bf16.msra.mxu1 %v10386_v21 }
  0xb9   :  { %8915 = vmatprep.subr.bf16.mxu1 %v10219_v0 }
  0xbc   :  { %8917 = vmatpush3.bf16.msra.mxu1 %v10388_v22 }
  0xbd   :  { %8918 = vmatprep.subr.bf16.mxu1 %v10219_v0 }
  0xc0   :  { %8920 = vmatpush3.bf16.msra.mxu1 %v10390_v23 }
  0xc1   :  { %8921 = vmatprep.subr.bf16.mxu1 %v10219_v0 }
  0xc4   :  { %8923 = vmatpush3.bf16.msra.mxu1 %v10394_v27 }
  0xc5   :  { %8924 = vmatprep.subr.bf16.mxu1 %v10219_v0 }
  0xc6   :  { %v64_v25 = vpop.permute.xlu0 %63 }
  0xc7   :  { %v72_v8 = vmul.f32 %v10594_v24, %v64_v25 }
  0xc8   :  { %8926 = vmatpush3.bf16.msra.mxu1 %v10398_v28 }
  0xc9   :  { %8927 = vmatprep.subr.bf16.mxu1 %v10219_v0  ;;  %v79_v29 = vadd.f32 %v10600_v26, %v72_v8 }
  0xcb   :  { %7090 = vmatmul.mubr.f32.vlgmr.msra.gmra.mrb[8].mxu1 %v10221_v1 }
  0xcc   :  { %8929 = vmatpush3.bf16.msra.mxu1 %v10289_v12  ;;  %7124 = vmatprep.mubr.msk.f32.mxu1 %vm10220_vm0, %v10221_v1 }
  0xcd   :  { %8930 = vmatprep.subr.bf16.mxu1 %v10219_v0 }
  0xd0   :  { %8932 = vmatpush3.bf16.msra.mxu1 %v10292_v13 }
  0xd1   :  { %8933 = vmatprep.subr.bf16.mxu1 %v10219_v0 }
  0xd4   :  { %8935 = vmatpush3.bf16.msra.mxu1 %v10298_v18 }
  0xd5   :  { %8936 = vmatprep.subr.bf16.mxu1 %v10219_v0 }
  0xd8   :  { %8938 = vmatpush3.bf16.msra.mxu1 %v10304_v30 }
  0xd9   :  { %8939 = vmatprep.subr.bf16.mxu1 %v10219_v0 }
  0xdc   :  { %8941 = vmatpush3.bf16.msra.mxu1 %v10316_v41 }
  0xdd   :  { %8942 = vmatprep.subr.bf16.mxu1 %v10219_v0 }
  0xe0   :  { %8944 = vmatpush3.bf16.msra.mxu1 %v10320_v42 }
  0xe1   :  { %8945 = vmatprep.subr.bf16.mxu1 %v10219_v0 }
  0xe4   :  { %8947 = vmatpush3.bf16.msra.mxu1 %v10322_v43 }
  0xe5   :  { %8948 = vmatprep.subr.bf16.mxu1 %v10219_v0 }
  0xe8   :  { %8950 = vmatpush3.bf16.msra.mxu1 %v10324_v44 }
  0xe9   :  { %8975 = vmatprep.subr.bf16.mxu1 %v10219_v0 }
  0xeb   :  { %7125 = vmatmul.mubr.f32.vlgmr.msra.gmra.mrb[10].mxu1 %v10221_v1 }
  0xec   :  { %8977 = vmatpush3.bf16.msra.mxu1 %v10403_v31  ;;  %7194 = vmatprep.mubr.msk.f32.mxu1 %vm10220_vm0, %v10221_v1 }
  0xed   :  { %8978 = vmatprep.subr.bf16.mxu1 %v10219_v0 }
  0xf0   :  { %8980 = vmatpush3.bf16.msra.mxu1 %v10413_v37 }
  0xf1   :  { %8981 = vmatprep.subr.bf16.mxu1 %v10219_v0 }
  0xf4   :  { %8983 = vmatpush3.bf16.msra.mxu1 %v10419_v60 }
  0xf5   :  { %8984 = vmatprep.subr.bf16.mxu1 %v10219_v0 }
  0xf8   :  { %8986 = vmatpush3.bf16.msra.mxu1 %v10424_v2 }
  0xf9   :  { %8987 = vmatprep.subr.bf16.mxu1 %v10219_v0 }
  0xfc   :  { %8989 = vmatpush3.bf16.msra.mxu1 %v10432_v7 }
  0xfd   :  { %8990 = vmatprep.subr.bf16.mxu1 %v10219_v0 }
 0x100   :  { %8992 = vmatpush3.bf16.msra.mxu1 %v10437_v9 }
 0x101   :  { %8993 = vmatprep.subr.bf16.mxu1 %v10219_v0 }
 0x104   :  { %8995 = vmatpush3.bf16.msra.mxu1 %v10443_v34 }
 0x105   :  { %8996 = vmatprep.subr.bf16.mxu1 %v10219_v0 }
 0x108   :  { %8998 = vmatpush3.bf16.msra.mxu1 %v10447_v36 }
 0x109   :  { %9023 = vmatprep.subr.bf16.mxu1 %v10219_v0 }
 0x11e   :  { %v183_v56 = vpop.f32.mrb[0].mxu1 }
 0x11f   :  { %v6951_v57 = vpop.f32.mrb[1].mxu1 }
 0x13e   :  { %v334_v58 = vpop.f32.mrb[2].mxu1 }
 0x13f   :  { %v335_v62 = vadd.f32 %v334_v58, %v183_v56  ;;  %v6986_v4 = vpop.f32.mrb[3].mxu1 }
 0x15e   :  { %v438_v45 = vpop.f32.mrb[4].mxu1 }
 0x15f   :  { %v439_v46 = vadd.f32 %v438_v45, %v335_v62  ;;  %v7021_v49 = vpop.f32.mrb[5].mxu1 }
 0x160   :  { %v5993_v49 = vld [vmem:[%s11679_s0 + $0x18] sm:$0xff] }
 0x17e   :  { %v527_v59 = vpop.f32.mrb[6].mxu1 }
 0x17f   :  { %v528_v61 = vadd.f32 %v527_v59, %v439_v46  ;;  %v7056_v63 = vpop.f32.mrb[7].mxu1  ;;  %v5992_v46 = vld [vmem:[%s11679_s0 + $0x10] sm:$0xff] }
 0x180   :  { %1395 = vperm.xlu1 %10124, %v5992_v46  }
 0x184   :  { %2047 = vperm.xlu1 %10124, %v5993_v49  }
 0x19e   :  { %v646_v3 = vpop.f32.mrb[8].mxu1 }
 0x19f   :  { %v647_v5 = vadd.f32 %v646_v3, %v528_v61  ;;  %v7091_v6 = vpop.f32.mrb[9].mxu1  ;;  %v5995_v3 = vld [vmem:[%s11679_s0 + $0x28] sm:$0xff] }
 0x1a0   :  { %3351 = vperm.xlu1 %10124, %v5995_v3   ;;  %v5997_v6 = vld [vmem:[%s11679_s0 + $0x38] sm:$0xff] }
 0x1a4   :  { %4655 = vperm.xlu1 %10124, %v5997_v6  }
 0x1be   :  { %v733_v32 = vpop.f32.mrb[10].mxu1 }
 0x1bf   :  { %v734_v10 = vadd.f32 %v733_v32, %v647_v5  ;;  %v7126_v33 = vpop.f32.mrb[11].mxu1 }
 0x1c1   :  { %v737_v11 = vadd.f32 %v734_v10, %v79_v29  ;;  %v744_v29 = vpop.permute.xlu0 %743 }
 0x1c2   :  { %v746_v32 = vmul.f32 %v10594_v24, %v744_v29 }
 0x1c3   :  { %10125 = vtanh.f32 %v737_v11 }
 0x1cd   :  { %v10126_v35 = vpop.eup %10125 }
 0x1ce   :  { %v10603_v14 = vand.u32 4294901760, %v10126_v35 }
 0x1d0   :  { %7195 = vmatmul.mubr.f32.vlgmr.msra.gmra.mrb[12].mxu1 %v10603_v14  ;;  %v830_v51 = vsub.f32 %v10126_v35, %v10603_v14  ;;  %v747_v35 = vadd.f32 %v10600_v26, %v746_v32 }
 0x1d1   :  { %9025 = vmatpush3.bf16.msra.mxu1 %v10289_v12  ;;  %7264 = vmatprep.mubr.msk.f32.mxu1 %vm10220_vm0, %v10221_v1 }
 0x1d2   :  { %9026 = vmatprep.subr.bf16.mxu1 %v10219_v0  ;;  %v831_v52 = vand.u32 4294901760, %v830_v51 }
 0x1d4   :  { %v832_v53 = vsub.f32 %v830_v51, %v831_v52 }
 0x1d5   :  { %9028 = vmatpush3.bf16.msra.mxu1 %v10292_v13 }
 0x1d6   :  { %9029 = vmatprep.subr.bf16.mxu1 %v10219_v0  ;;  %v833_v54 = vand.u32 4294901760, %v832_v53 }
 0x1d8   :  { %7160 = vmatmul.mubr.f32.vlgmr.msra.gmra.mrb[0].mxu0 %v833_v54 }
 0x1d9   :  { %9001 = vmatpush3.bf16.msra.mxu0 %v10453_v15  ;;  %9031 = vmatpush3.bf16.msra.mxu1 %v10298_v18 }
 0x1da   :  { %9002 = vmatprep.subr.bf16.mxu0 %v10219_v0  ;;  %9032 = vmatprep.subr.bf16.mxu1 %v10219_v0 }
 0x1db   :  { %7229 = vmatprep.mubr.msk.f32.mxu0 %vm10220_vm0, %v10221_v1 }
 0x1dd   :  { %9004 = vmatpush3.bf16.msra.mxu0 %v10460_v20  ;;  %9034 = vmatpush3.bf16.msra.mxu1 %v10304_v30 }
 0x1de   :  { %9005 = vmatprep.subr.bf16.mxu0 %v10219_v0  ;;  %9035 = vmatprep.subr.bf16.mxu1 %v10219_v0 }
 0x1e1   :  { %9007 = vmatpush3.bf16.msra.mxu0 %v10468_v38  ;;  %9037 = vmatpush3.bf16.msra.mxu1 %v10316_v41 }
 0x1e2   :  { %9008 = vmatprep.subr.bf16.mxu0 %v10219_v0  ;;  %9038 = vmatprep.subr.bf16.mxu1 %v10219_v0 }
 0x1e5   :  { %9010 = vmatpush3.bf16.msra.mxu0 %v10474_v39  ;;  %9040 = vmatpush3.bf16.msra.mxu1 %v10320_v42 }
 0x1e6   :  { %9011 = vmatprep.subr.bf16.mxu0 %v10219_v0  ;;  %9041 = vmatprep.subr.bf16.mxu1 %v10219_v0 }
 0x1e9   :  { %9013 = vmatpush3.bf16.msra.mxu0 %v10480_v40  ;;  %9043 = vmatpush3.bf16.msra.mxu1 %v10322_v43 }
 0x1ea   :  { %9014 = vmatprep.subr.bf16.mxu0 %v10219_v0  ;;  %9044 = vmatprep.subr.bf16.mxu1 %v10219_v0 }
 0x1ed   :  { %9016 = vmatpush3.bf16.msra.mxu0 %v10486_v47  ;;  %9046 = vmatpush3.bf16.msra.mxu1 %v10324_v44 }
 0x1ee   :  { %9017 = vmatprep.subr.bf16.mxu0 %v10219_v0  ;;  %9071 = vmatprep.subr.bf16.mxu1 %v10219_v0 }
 0x1f0   :  { %7265 = vmatmul.mubr.f32.vlgmr.msra.gmra.mrb[14].mxu1 %v831_v52 }
 0x1f1   :  { %9019 = vmatpush3.bf16.msra.mxu0 %v10492_v48  ;;  %9073 = vmatpush3.bf16.msra.mxu1 %v10289_v12 }
 0x1f2   :  { %9020 = vmatprep.subr.bf16.mxu0 %v10219_v0  ;;  %9074 = vmatprep.subr.bf16.mxu1 %v10219_v0 }
 0x1f3   :  { %7334 = vmatprep.mubr.msk.f32.mxu1 %vm10220_vm0, %v10221_v1 }
 0x1f5   :  { %9022 = vmatpush3.bf16.msra.mxu0 %v10498_v50  ;;  %9076 = vmatpush3.bf16.msra.mxu1 %v10292_v13 }
 0x1f6   :  { %9047 = vmatprep.subr.bf16.mxu0 %v10219_v0  ;;  %9077 = vmatprep.subr.bf16.mxu1 %v10219_v0 }
 0x1f8   :  { %7230 = vmatmul.mubr.f32.vlgmr.msra.gmra.mrb[2].mxu0 %v830_v51 }
 0x1f9   :  { %9049 = vmatpush3.bf16.msra.mxu0 %v10379_v16  ;;  %9079 = vmatpush3.bf16.msra.mxu1 %v10298_v18 }
 0x1fa   :  { %9050 = vmatprep.subr.bf16.mxu0 %v10219_v0  ;;  %9080 = vmatprep.subr.bf16.mxu1 %v10219_v0 }
 0x1fb   :  { %7299 = vmatprep.mubr.msk.f32.mxu0 %vm10220_vm0, %v10221_v1 }
 0x1fd   :  { %9052 = vmatpush3.bf16.msra.mxu0 %v10381_v17  ;;  %9082 = vmatpush3.bf16.msra.mxu1 %v10304_v30 }
 0x1fe   :  { %9053 = vmatprep.subr.bf16.mxu0 %v10219_v0  ;;  %9083 = vmatprep.subr.bf16.mxu1 %v10219_v0 }
 0x201   :  { %9055 = vmatpush3.bf16.msra.mxu0 %v10383_v19  ;;  %9085 = vmatpush3.bf16.msra.mxu1 %v10316_v41 }
 0x202   :  { %9056 = vmatprep.subr.bf16.mxu0 %v10219_v0  ;;  %9086 = vmatprep.subr.bf16.mxu1 %v10219_v0 }
 0x205   :  { %9058 = vmatpush3.bf16.msra.mxu0 %v10386_v21  ;;  %9088 = vmatpush3.bf16.msra.mxu1 %v10320_v42 }
 0x206   :  { %9059 = vmatprep.subr.bf16.mxu0 %v10219_v0  ;;  %9089 = vmatprep.subr.bf16.mxu1 %v10219_v0 }
 0x209   :  { %9061 = vmatpush3.bf16.msra.mxu0 %v10388_v22  ;;  %9091 = vmatpush3.bf16.msra.mxu1 %v10322_v43 }
 0x20a   :  { %9062 = vmatprep.subr.bf16.mxu0 %v10219_v0  ;;  %9092 = vmatprep.subr.bf16.mxu1 %v10219_v0 }
 0x20d   :  { %9064 = vmatpush3.bf16.msra.mxu0 %v10390_v23  ;;  %9094 = vmatpush3.bf16.msra.mxu1 %v10324_v44 }
 0x20e   :  { %9065 = vmatprep.subr.bf16.mxu0 %v10219_v0  ;;  %9119 = vmatprep.subr.bf16.mxu1 %v10219_v0 }
 0x210   :  { %7335 = vmatmul.mubr.f32.vlgmr.msra.gmra.mrb[16].mxu1 %v10603_v14 }
 0x211   :  { %9067 = vmatpush3.bf16.msra.mxu0 %v10394_v27  ;;  %9121 = vmatpush3.bf16.msra.mxu1 %v10403_v31 }
 0x212   :  { %9068 = vmatprep.subr.bf16.mxu0 %v10219_v0  ;;  %9122 = vmatprep.subr.bf16.mxu1 %v10219_v0 }
 0x213   :  { %7404 = vmatprep.mubr.msk.f32.mxu1 %vm10220_vm0, %v10221_v1 }
 0x215   :  { %9070 = vmatpush3.bf16.msra.mxu0 %v10398_v28  ;;  %9124 = vmatpush3.bf16.msra.mxu1 %v10413_v37 }
 0x216   :  { %9095 = vmatprep.subr.bf16.mxu0 %v10219_v0  ;;  %9125 = vmatprep.subr.bf16.mxu1 %v10219_v0 }
 0x218   :  { %7300 = vmatmul.mubr.f32.vlgmr.msra.gmra.mrb[4].mxu0 %v10603_v14 }
 0x219   :  { %9097 = vmatpush3.bf16.msra.mxu0 %v10289_v12  ;;  %9127 = vmatpush3.bf16.msra.mxu1 %v10419_v60 }
 0x21a   :  { %9098 = vmatprep.subr.bf16.mxu0 %v10219_v0  ;;  %9128 = vmatprep.subr.bf16.mxu1 %v10219_v0 }
 0x21b   :  { %7369 = vmatprep.mubr.msk.f32.mxu0 %vm10220_vm0, %v10221_v1 }
 0x21d   :  { %9100 = vmatpush3.bf16.msra.mxu0 %v10292_v13  ;;  %9130 = vmatpush3.bf16.msra.mxu1 %v10424_v2 }
 0x21e   :  { %9101 = vmatprep.subr.bf16.mxu0 %v10219_v0  ;;  %9131 = vmatprep.subr.bf16.mxu1 %v10219_v0 }
 0x221   :  { %9103 = vmatpush3.bf16.msra.mxu0 %v10298_v18  ;;  %9133 = vmatpush3.bf16.msra.mxu1 %v10432_v7 }
 0x222   :  { %9104 = vmatprep.subr.bf16.mxu0 %v10219_v0  ;;  %9134 = vmatprep.subr.bf16.mxu1 %v10219_v0 }
 0x225   :  { %9106 = vmatpush3.bf16.msra.mxu0 %v10304_v30  ;;  %9136 = vmatpush3.bf16.msra.mxu1 %v10437_v9 }
 0x226   :  { %9107 = vmatprep.subr.bf16.mxu0 %v10219_v0  ;;  %9137 = vmatprep.subr.bf16.mxu1 %v10219_v0 }
 0x229   :  { %9109 = vmatpush3.bf16.msra.mxu0 %v10316_v41  ;;  %9139 = vmatpush3.bf16.msra.mxu1 %v10443_v34 }
 0x22a   :  { %9110 = vmatprep.subr.bf16.mxu0 %v10219_v0  ;;  %9140 = vmatprep.subr.bf16.mxu1 %v10219_v0 }
 0x22d   :  { %9112 = vmatpush3.bf16.msra.mxu0 %v10320_v42  ;;  %9142 = vmatpush3.bf16.msra.mxu1 %v10447_v36 }
 0x22e   :  { %9113 = vmatprep.subr.bf16.mxu0 %v10219_v0  ;;  %9167 = vmatprep.subr.bf16.mxu1 %v10219_v0 }
 0x231   :  { %9115 = vmatpush3.bf16.msra.mxu0 %v10322_v43 }
 0x232   :  { %9116 = vmatprep.subr.bf16.mxu0 %v10219_v0 }
 0x235   :  { %9118 = vmatpush3.bf16.msra.mxu0 %v10324_v44 }
 0x236   :  { %9143 = vmatprep.subr.bf16.mxu0 %v10219_v0 }
 0x2a3   :  { %v986_v55 = vpop.f32.mrb[12].mxu1 }
 0x2a4   :  { %v7196_v56 = vpop.f32.mrb[13].mxu1 }
 0x2ab   :  { %v835_v57 = vpop.f32.mrb[0].mxu0 }
 0x2ac   :  { %v987_v58 = vadd.f32 %v986_v55, %v835_v57  ;;  %v7161_v62 = vpop.f32.mrb[1].mxu0 }
 0x2c3   :  { %v1179_v4 = vpop.f32.mrb[14].mxu1 }
 0x2c4   :  { %v7266_v45 = vpop.f32.mrb[15].mxu1 }
 0x2cb   :  { %v1090_v59 = vpop.f32.mrb[2].mxu0 }
 0x2cc   :  { %v1091_v61 = vadd.f32 %v1090_v59, %v987_v58  ;;  %v7231_v63 = vpop.f32.mrb[3].mxu0 }
 0x2ce   :  { %v1180_v5 = vadd.f32 %v1179_v4, %v1091_v61 }
 0x2e3   :  { %v1385_v25 = vpop.f32.mrb[16].mxu1 }
 0x2e4   :  { %v7336_v8 = vpop.f32.mrb[17].mxu1 }
 0x2e5   :  { %v1396_v8 = vpop.permute.xlu1 %1395 }
 0x2e6   :  { %v1398_v29 = vmul.f32 %v10594_v24, %v1396_v8 }
 0x2eb   :  { %v1298_v10 = vpop.f32.mrb[4].mxu0 }
 0x2ec   :  { %v1299_v33 = vadd.f32 %v1298_v10, %v1180_v5  ;;  %v7301_v11 = vpop.f32.mrb[5].mxu0  ;;  %v1399_v10 = vadd.f32 %v10600_v26, %v1398_v29 }
 0x2ee   :  { %v1386_v14 = vadd.f32 %v1385_v25, %v1299_v33 }
 0x2f0   :  { %v1389_v51 = vadd.f32 %v1386_v14, %v747_v35 }
 0x2f2   :  { %10127 = vtanh.f32 %v1389_v51 }
 0x2fc   :  { %v10128_v52 = vpop.eup %10127 }
 0x2fd   :  { %v10731_v53 = vand.u32 4294901760, %v10128_v52 }
 0x2ff   :  { %7405 = vmatmul.mubr.f32.vlgmr.msra.gmra.mrb[18].mxu1 %v10731_v53  ;;  %v1482_v54 = vsub.f32 %v10128_v52, %v10731_v53 }
 0x300   :  { %9169 = vmatpush3.bf16.msra.mxu1 %v10289_v12  ;;  %7474 = vmatprep.mubr.msk.f32.mxu1 %vm10220_vm0, %v10221_v1 }
 0x301   :  { %9170 = vmatprep.subr.bf16.mxu1 %v10219_v0  ;;  %v1483_v55 = vand.u32 4294901760, %v1482_v54 }
 0x303   :  { %v1484_v56 = vsub.f32 %v1482_v54, %v1483_v55 }
 0x304   :  { %9172 = vmatpush3.bf16.msra.mxu1 %v10292_v13 }
 0x305   :  { %9173 = vmatprep.subr.bf16.mxu1 %v10219_v0  ;;  %v1485_v57 = vand.u32 4294901760, %v1484_v56 }
 0x307   :  { %7370 = vmatmul.mubr.f32.vlgmr.msra.gmra.mrb[6].mxu0 %v1485_v57 }
 0x308   :  { %9145 = vmatpush3.bf16.msra.mxu0 %v10453_v15  ;;  %9175 = vmatpush3.bf16.msra.mxu1 %v10298_v18 }
 0x309   :  { %9146 = vmatprep.subr.bf16.mxu0 %v10219_v0  ;;  %9176 = vmatprep.subr.bf16.mxu1 %v10219_v0 }
 0x30a   :  { %7439 = vmatprep.mubr.msk.f32.mxu0 %vm10220_vm0, %v10221_v1 }
 0x30c   :  { %9148 = vmatpush3.bf16.msra.mxu0 %v10460_v20  ;;  %9178 = vmatpush3.bf16.msra.mxu1 %v10304_v30 }
 0x30d   :  { %9149 = vmatprep.subr.bf16.mxu0 %v10219_v0  ;;  %9179 = vmatprep.subr.bf16.mxu1 %v10219_v0 }
 0x310   :  { %9151 = vmatpush3.bf16.msra.mxu0 %v10468_v38  ;;  %9181 = vmatpush3.bf16.msra.mxu1 %v10316_v41 }
 0x311   :  { %9152 = vmatprep.subr.bf16.mxu0 %v10219_v0  ;;  %9182 = vmatprep.subr.bf16.mxu1 %v10219_v0 }
 0x314   :  { %9154 = vmatpush3.bf16.msra.mxu0 %v10474_v39  ;;  %9184 = vmatpush3.bf16.msra.mxu1 %v10320_v42 }
 0x315   :  { %9155 = vmatprep.subr.bf16.mxu0 %v10219_v0  ;;  %9185 = vmatprep.subr.bf16.mxu1 %v10219_v0 }
 0x318   :  { %9157 = vmatpush3.bf16.msra.mxu0 %v10480_v40  ;;  %9187 = vmatpush3.bf16.msra.mxu1 %v10322_v43 }
 0x319   :  { %9158 = vmatprep.subr.bf16.mxu0 %v10219_v0  ;;  %9188 = vmatprep.subr.bf16.mxu1 %v10219_v0 }
 0x31c   :  { %9160 = vmatpush3.bf16.msra.mxu0 %v10486_v47  ;;  %9190 = vmatpush3.bf16.msra.mxu1 %v10324_v44 }
 0x31d   :  { %9161 = vmatprep.subr.bf16.mxu0 %v10219_v0  ;;  %9215 = vmatprep.subr.bf16.mxu1 %v10219_v0 }
 0x31f   :  { %7475 = vmatmul.mubr.f32.vlgmr.msra.gmra.mrb[20].mxu1 %v1483_v55 }
 0x320   :  { %9163 = vmatpush3.bf16.msra.mxu0 %v10492_v48  ;;  %9217 = vmatpush3.bf16.msra.mxu1 %v10289_v12 }
 0x321   :  { %9164 = vmatprep.subr.bf16.mxu0 %v10219_v0  ;;  %9218 = vmatprep.subr.bf16.mxu1 %v10219_v0 }
 0x322   :  { %7544 = vmatprep.mubr.msk.f32.mxu1 %vm10220_vm0, %v10221_v1 }
 0x324   :  { %9166 = vmatpush3.bf16.msra.mxu0 %v10498_v50  ;;  %9220 = vmatpush3.bf16.msra.mxu1 %v10292_v13 }
 0x325   :  { %9191 = vmatprep.subr.bf16.mxu0 %v10219_v0  ;;  %9221 = vmatprep.subr.bf16.mxu1 %v10219_v0 }
 0x327   :  { %7440 = vmatmul.mubr.f32.vlgmr.msra.gmra.mrb[8].mxu0 %v1482_v54 }
 0x328   :  { %9193 = vmatpush3.bf16.msra.mxu0 %v10379_v16  ;;  %9223 = vmatpush3.bf16.msra.mxu1 %v10298_v18 }
 0x329   :  { %9194 = vmatprep.subr.bf16.mxu0 %v10219_v0  ;;  %9224 = vmatprep.subr.bf16.mxu1 %v10219_v0 }
 0x32a   :  { %7509 = vmatprep.mubr.msk.f32.mxu0 %vm10220_vm0, %v10221_v1 }
 0x32c   :  { %9196 = vmatpush3.bf16.msra.mxu0 %v10381_v17  ;;  %9226 = vmatpush3.bf16.msra.mxu1 %v10304_v30 }
 0x32d   :  { %9197 = vmatprep.subr.bf16.mxu0 %v10219_v0  ;;  %9227 = vmatprep.subr.bf16.mxu1 %v10219_v0 }
 0x330   :  { %9199 = vmatpush3.bf16.msra.mxu0 %v10383_v19  ;;  %9229 = vmatpush3.bf16.msra.mxu1 %v10316_v41 }
 0x331   :  { %9200 = vmatprep.subr.bf16.mxu0 %v10219_v0  ;;  %9230 = vmatprep.subr.bf16.mxu1 %v10219_v0 }
 0x334   :  { %9202 = vmatpush3.bf16.msra.mxu0 %v10386_v21  ;;  %9232 = vmatpush3.bf16.msra.mxu1 %v10320_v42 }
 0x335   :  { %9203 = vmatprep.subr.bf16.mxu0 %v10219_v0  ;;  %9233 = vmatprep.subr.bf16.mxu1 %v10219_v0 }
 0x338   :  { %9205 = vmatpush3.bf16.msra.mxu0 %v10388_v22  ;;  %9235 = vmatpush3.bf16.msra.mxu1 %v10322_v43 }
 0x339   :  { %9206 = vmatprep.subr.bf16.mxu0 %v10219_v0  ;;  %9236 = vmatprep.subr.bf16.mxu1 %v10219_v0 }
 0x33c   :  { %9208 = vmatpush3.bf16.msra.mxu0 %v10390_v23  ;;  %9238 = vmatpush3.bf16.msra.mxu1 %v10324_v44 }
 0x33d   :  { %9209 = vmatprep.subr.bf16.mxu0 %v10219_v0  ;;  %9263 = vmatprep.subr.bf16.mxu1 %v10219_v0 }
 0x33f   :  { %7545 = vmatmul.mubr.f32.vlgmr.msra.gmra.mrb[22].mxu1 %v10731_v53 }
 0x340   :  { %9211 = vmatpush3.bf16.msra.mxu0 %v10394_v27  ;;  %9265 = vmatpush3.bf16.msra.mxu1 %v10403_v31 }
 0x341   :  { %9212 = vmatprep.subr.bf16.mxu0 %v10219_v0  ;;  %9266 = vmatprep.subr.bf16.mxu1 %v10219_v0 }
 0x342   :  { %7614 = vmatprep.mubr.msk.f32.mxu1 %vm10220_vm0, %v10221_v1 }
 0x344   :  { %9214 = vmatpush3.bf16.msra.mxu0 %v10398_v28  ;;  %9268 = vmatpush3.bf16.msra.mxu1 %v10413_v37 }
 0x345   :  { %9239 = vmatprep.subr.bf16.mxu0 %v10219_v0  ;;  %9269 = vmatprep.subr.bf16.mxu1 %v10219_v0 }
 0x347   :  { %7510 = vmatmul.mubr.f32.vlgmr.msra.gmra.mrb[10].mxu0 %v10731_v53 }
 0x348   :  { %9241 = vmatpush3.bf16.msra.mxu0 %v10289_v12  ;;  %9271 = vmatpush3.bf16.msra.mxu1 %v10419_v60 }
 0x349   :  { %9242 = vmatprep.subr.bf16.mxu0 %v10219_v0  ;;  %9272 = vmatprep.subr.bf16.mxu1 %v10219_v0 }
 0x34a   :  { %7579 = vmatprep.mubr.msk.f32.mxu0 %vm10220_vm0, %v10221_v1 }
 0x34c   :  { %9244 = vmatpush3.bf16.msra.mxu0 %v10292_v13  ;;  %9274 = vmatpush3.bf16.msra.mxu1 %v10424_v2 }
 0x34d   :  { %9245 = vmatprep.subr.bf16.mxu0 %v10219_v0  ;;  %9275 = vmatprep.subr.bf16.mxu1 %v10219_v0 }
 0x350   :  { %9247 = vmatpush3.bf16.msra.mxu0 %v10298_v18  ;;  %9277 = vmatpush3.bf16.msra.mxu1 %v10432_v7 }
 0x351   :  { %9248 = vmatprep.subr.bf16.mxu0 %v10219_v0  ;;  %9278 = vmatprep.subr.bf16.mxu1 %v10219_v0 }
 0x354   :  { %9250 = vmatpush3.bf16.msra.mxu0 %v10304_v30  ;;  %9280 = vmatpush3.bf16.msra.mxu1 %v10437_v9 }
 0x355   :  { %9251 = vmatprep.subr.bf16.mxu0 %v10219_v0  ;;  %9281 = vmatprep.subr.bf16.mxu1 %v10219_v0 }
 0x358   :  { %9253 = vmatpush3.bf16.msra.mxu0 %v10316_v41  ;;  %9283 = vmatpush3.bf16.msra.mxu1 %v10443_v34 }
 0x359   :  { %9254 = vmatprep.subr.bf16.mxu0 %v10219_v0  ;;  %9284 = vmatprep.subr.bf16.mxu1 %v10219_v0 }
 0x35c   :  { %9256 = vmatpush3.bf16.msra.mxu0 %v10320_v42  ;;  %9286 = vmatpush3.bf16.msra.mxu1 %v10447_v36 }
 0x35d   :  { %9257 = vmatprep.subr.bf16.mxu0 %v10219_v0  ;;  %9311 = vmatprep.subr.bf16.mxu1 %v10219_v0 }
 0x360   :  { %9259 = vmatpush3.bf16.msra.mxu0 %v10322_v43 }
 0x361   :  { %9260 = vmatprep.subr.bf16.mxu0 %v10219_v0 }
 0x364   :  { %9262 = vmatpush3.bf16.msra.mxu0 %v10324_v44 }
 0x365   :  { %9287 = vmatprep.subr.bf16.mxu0 %v10219_v0 }
 0x3d2   :  { %v1638_v58 = vpop.f32.mrb[18].mxu1 }
 0x3d3   :  { %v7406_v62 = vpop.f32.mrb[19].mxu1 }
 0x3da   :  { %v1487_v4 = vpop.f32.mrb[6].mxu0 }
 0x3db   :  { %v1639_v45 = vadd.f32 %v1638_v58, %v1487_v4  ;;  %v7371_v46 = vpop.f32.mrb[7].mxu0 }
 0x3f2   :  { %v1831_v49 = vpop.f32.mrb[20].mxu1 }
 0x3f3   :  { %v7476_v59 = vpop.f32.mrb[21].mxu1 }
 0x3fa   :  { %v1742_v61 = vpop.f32.mrb[8].mxu0 }
 0x3fb   :  { %v1743_v63 = vadd.f32 %v1742_v61, %v1639_v45  ;;  %v7441_v3 = vpop.f32.mrb[9].mxu0 }
 0x3fd   :  { %v1832_v5 = vadd.f32 %v1831_v49, %v1743_v63 }
 0x412   :  { %v2037_v6 = vpop.f32.mrb[22].mxu1 }
 0x413   :  { %v7546_v25 = vpop.f32.mrb[23].mxu1 }
 0x414   :  { %v2048_v25 = vpop.permute.xlu1 %2047 }
 0x415   :  { %v2050_v8 = vmul.f32 %v10594_v24, %v2048_v25 }
 0x41a   :  { %v1950_v32 = vpop.f32.mrb[10].mxu0 }
 0x41b   :  { %v1951_v33 = vadd.f32 %v1950_v32, %v1832_v5  ;;  %v7511_v11 = vpop.f32.mrb[11].mxu0 }
 0x41d   :  { %v2038_v35 = vadd.f32 %v2037_v6, %v1951_v33  ;;  %v2051_v33 = vadd.f32 %v10600_v26, %v2050_v8 }
 0x41f   :  { %v2041_v14 = vadd.f32 %v2038_v35, %v1399_v10 }
 0x421   :  { %10129 = vtanh.f32 %v2041_v14 }
 0x42b   :  { %v10130_v51 = vpop.eup %10129 }
 0x42c   :  { %v10847_v52 = vand.u32 4294901760, %v10130_v51 }
 0x42e   :  { %7615 = vmatmul.mubr.f32.vlgmr.msra.gmra.mrb[24].mxu1 %v10847_v52  ;;  %v2134_v53 = vsub.f32 %v10130_v51, %v10847_v52 }
 0x42f   :  { %9313 = vmatpush3.bf16.msra.mxu1 %v10289_v12  ;;  %7684 = vmatprep.mubr.msk.f32.mxu1 %vm10220_vm0, %v10221_v1 }
 0x430   :  { %9314 = vmatprep.subr.bf16.mxu1 %v10219_v0  ;;  %v2135_v54 = vand.u32 4294901760, %v2134_v53 }
 0x432   :  { %v2136_v55 = vsub.f32 %v2134_v53, %v2135_v54 }
 0x433   :  { %9316 = vmatpush3.bf16.msra.mxu1 %v10292_v13 }
 0x434   :  { %9317 = vmatprep.subr.bf16.mxu1 %v10219_v0  ;;  %v2137_v56 = vand.u32 4294901760, %v2136_v55 }
 0x436   :  { %7580 = vmatmul.mubr.f32.vlgmr.msra.gmra.mrb[12].mxu0 %v2137_v56 }
 0x437   :  { %9289 = vmatpush3.bf16.msra.mxu0 %v10453_v15  ;;  %9319 = vmatpush3.bf16.msra.mxu1 %v10298_v18 }
 0x438   :  { %9290 = vmatprep.subr.bf16.mxu0 %v10219_v0  ;;  %9320 = vmatprep.subr.bf16.mxu1 %v10219_v0 }
 0x439   :  { %7649 = vmatprep.mubr.msk.f32.mxu0 %vm10220_vm0, %v10221_v1 }
 0x43b   :  { %9292 = vmatpush3.bf16.msra.mxu0 %v10460_v20  ;;  %9322 = vmatpush3.bf16.msra.mxu1 %v10304_v30 }
 0x43c   :  { %9293 = vmatprep.subr.bf16.mxu0 %v10219_v0  ;;  %9323 = vmatprep.subr.bf16.mxu1 %v10219_v0 }
 0x43f   :  { %9295 = vmatpush3.bf16.msra.mxu0 %v10468_v38  ;;  %9325 = vmatpush3.bf16.msra.mxu1 %v10316_v41 }
 0x440   :  { %9296 = vmatprep.subr.bf16.mxu0 %v10219_v0  ;;  %9326 = vmatprep.subr.bf16.mxu1 %v10219_v0 }
 0x443   :  { %9298 = vmatpush3.bf16.msra.mxu0 %v10474_v39  ;;  %9328 = vmatpush3.bf16.msra.mxu1 %v10320_v42 }
 0x444   :  { %9299 = vmatprep.subr.bf16.mxu0 %v10219_v0  ;;  %9329 = vmatprep.subr.bf16.mxu1 %v10219_v0 }
 0x447   :  { %9301 = vmatpush3.bf16.msra.mxu0 %v10480_v40  ;;  %9331 = vmatpush3.bf16.msra.mxu1 %v10322_v43 }
 0x448   :  { %9302 = vmatprep.subr.bf16.mxu0 %v10219_v0  ;;  %9332 = vmatprep.subr.bf16.mxu1 %v10219_v0 }
 0x44b   :  { %9304 = vmatpush3.bf16.msra.mxu0 %v10486_v47  ;;  %9334 = vmatpush3.bf16.msra.mxu1 %v10324_v44 }
 0x44c   :  { %9305 = vmatprep.subr.bf16.mxu0 %v10219_v0  ;;  %9359 = vmatprep.subr.bf16.mxu1 %v10219_v0 }
 0x44e   :  { %7685 = vmatmul.mubr.f32.vlgmr.msra.gmra.mrb[26].mxu1 %v2135_v54 }
 0x44f   :  { %9307 = vmatpush3.bf16.msra.mxu0 %v10492_v48  ;;  %9361 = vmatpush3.bf16.msra.mxu1 %v10289_v12 }
 0x450   :  { %9308 = vmatprep.subr.bf16.mxu0 %v10219_v0  ;;  %9362 = vmatprep.subr.bf16.mxu1 %v10219_v0 }
 0x451   :  { %7754 = vmatprep.mubr.msk.f32.mxu1 %vm10220_vm0, %v10221_v1 }
 0x453   :  { %9310 = vmatpush3.bf16.msra.mxu0 %v10498_v50  ;;  %9364 = vmatpush3.bf16.msra.mxu1 %v10292_v13 }
 0x454   :  { %9335 = vmatprep.subr.bf16.mxu0 %v10219_v0  ;;  %9365 = vmatprep.subr.bf16.mxu1 %v10219_v0 }
 0x456   :  { %7650 = vmatmul.mubr.f32.vlgmr.msra.gmra.mrb[14].mxu0 %v2134_v53 }
 0x457   :  { %9337 = vmatpush3.bf16.msra.mxu0 %v10379_v16  ;;  %9367 = vmatpush3.bf16.msra.mxu1 %v10298_v18 }
 0x458   :  { %9338 = vmatprep.subr.bf16.mxu0 %v10219_v0  ;;  %9368 = vmatprep.subr.bf16.mxu1 %v10219_v0 }
 0x459   :  { %7719 = vmatprep.mubr.msk.f32.mxu0 %vm10220_vm0, %v10221_v1 }
 0x45b   :  { %9340 = vmatpush3.bf16.msra.mxu0 %v10381_v17  ;;  %9370 = vmatpush3.bf16.msra.mxu1 %v10304_v30 }
 0x45c   :  { %9341 = vmatprep.subr.bf16.mxu0 %v10219_v0  ;;  %9371 = vmatprep.subr.bf16.mxu1 %v10219_v0 }
 0x45f   :  { %9343 = vmatpush3.bf16.msra.mxu0 %v10383_v19  ;;  %9373 = vmatpush3.bf16.msra.mxu1 %v10316_v41 }
 0x460   :  { %9344 = vmatprep.subr.bf16.mxu0 %v10219_v0  ;;  %9374 = vmatprep.subr.bf16.mxu1 %v10219_v0 }
 0x463   :  { %9346 = vmatpush3.bf16.msra.mxu0 %v10386_v21  ;;  %9376 = vmatpush3.bf16.msra.mxu1 %v10320_v42 }
 0x464   :  { %9347 = vmatprep.subr.bf16.mxu0 %v10219_v0  ;;  %9377 = vmatprep.subr.bf16.mxu1 %v10219_v0 }
 0x467   :  { %9349 = vmatpush3.bf16.msra.mxu0 %v10388_v22  ;;  %9379 = vmatpush3.bf16.msra.mxu1 %v10322_v43 }
 0x468   :  { %9350 = vmatprep.subr.bf16.mxu0 %v10219_v0  ;;  %9380 = vmatprep.subr.bf16.mxu1 %v10219_v0 }
 0x46b   :  { %9352 = vmatpush3.bf16.msra.mxu0 %v10390_v23  ;;  %9382 = vmatpush3.bf16.msra.mxu1 %v10324_v44 }
 0x46c   :  { %9353 = vmatprep.subr.bf16.mxu0 %v10219_v0  ;;  %9407 = vmatprep.subr.bf16.mxu1 %v10219_v0 }
 0x46e   :  { %7755 = vmatmul.mubr.f32.vlgmr.msra.gmra.mrb[28].mxu1 %v10847_v52 }
 0x46f   :  { %9355 = vmatpush3.bf16.msra.mxu0 %v10394_v27  ;;  %9409 = vmatpush3.bf16.msra.mxu1 %v10403_v31 }
 0x470   :  { %9356 = vmatprep.subr.bf16.mxu0 %v10219_v0  ;;  %9410 = vmatprep.subr.bf16.mxu1 %v10219_v0 }
 0x471   :  { %7824 = vmatprep.mubr.msk.f32.mxu1 %vm10220_vm0, %v10221_v1 }
 0x473   :  { %9358 = vmatpush3.bf16.msra.mxu0 %v10398_v28  ;;  %9412 = vmatpush3.bf16.msra.mxu1 %v10413_v37 }
 0x474   :  { %9383 = vmatprep.subr.bf16.mxu0 %v10219_v0  ;;  %9413 = vmatprep.subr.bf16.mxu1 %v10219_v0 }
 0x476   :  { %7720 = vmatmul.mubr.f32.vlgmr.msra.gmra.mrb[16].mxu0 %v10847_v52 }
 0x477   :  { %9385 = vmatpush3.bf16.msra.mxu0 %v10289_v12  ;;  %9415 = vmatpush3.bf16.msra.mxu1 %v10419_v60 }
 0x478   :  { %9386 = vmatprep.subr.bf16.mxu0 %v10219_v0  ;;  %9416 = vmatprep.subr.bf16.mxu1 %v10219_v0 }
 0x479   :  { %7789 = vmatprep.mubr.msk.f32.mxu0 %vm10220_vm0, %v10221_v1 }
 0x47b   :  { %9388 = vmatpush3.bf16.msra.mxu0 %v10292_v13  ;;  %9418 = vmatpush3.bf16.msra.mxu1 %v10424_v2 }
 0x47c   :  { %9389 = vmatprep.subr.bf16.mxu0 %v10219_v0  ;;  %9419 = vmatprep.subr.bf16.mxu1 %v10219_v0 }
 0x47f   :  { %9391 = vmatpush3.bf16.msra.mxu0 %v10298_v18  ;;  %9421 = vmatpush3.bf16.msra.mxu1 %v10432_v7 }
 0x480   :  { %9392 = vmatprep.subr.bf16.mxu0 %v10219_v0  ;;  %9422 = vmatprep.subr.bf16.mxu1 %v10219_v0 }
 0x483   :  { %9394 = vmatpush3.bf16.msra.mxu0 %v10304_v30  ;;  %9424 = vmatpush3.bf16.msra.mxu1 %v10437_v9 }
 0x484   :  { %9395 = vmatprep.subr.bf16.mxu0 %v10219_v0  ;;  %9425 = vmatprep.subr.bf16.mxu1 %v10219_v0 }
 0x487   :  { %9397 = vmatpush3.bf16.msra.mxu0 %v10316_v41  ;;  %9427 = vmatpush3.bf16.msra.mxu1 %v10443_v34 }
 0x488   :  { %9398 = vmatprep.subr.bf16.mxu0 %v10219_v0  ;;  %9428 = vmatprep.subr.bf16.mxu1 %v10219_v0 }
 0x48b   :  { %9400 = vmatpush3.bf16.msra.mxu0 %v10320_v42  ;;  %9430 = vmatpush3.bf16.msra.mxu1 %v10447_v36 }
 0x48c   :  { %9401 = vmatprep.subr.bf16.mxu0 %v10219_v0  ;;  %9455 = vmatprep.subr.bf16.mxu1 %v10219_v0 }
 0x48f   :  { %9403 = vmatpush3.bf16.msra.mxu0 %v10322_v43 }
 0x490   :  { %9404 = vmatprep.subr.bf16.mxu0 %v10219_v0 }
 0x493   :  { %9406 = vmatpush3.bf16.msra.mxu0 %v10324_v44 }
 0x494   :  { %9431 = vmatprep.subr.bf16.mxu0 %v10219_v0 }
 0x501   :  { %v2290_v57 = vpop.f32.mrb[24].mxu1 }
 0x502   :  { %v7616_v58 = vpop.f32.mrb[25].mxu1 }
 0x509   :  { %v2139_v62 = vpop.f32.mrb[12].mxu0 }
 0x50a   :  { %v2291_v4 = vadd.f32 %v2290_v57, %v2139_v62  ;;  %v7581_v45 = vpop.f32.mrb[13].mxu0 }
 0x521   :  { %v2483_v46 = vpop.f32.mrb[26].mxu1 }
 0x522   :  { %v7686_v49 = vpop.f32.mrb[27].mxu1 }
 0x529   :  { %v2394_v59 = vpop.f32.mrb[14].mxu0 }
 0x52a   :  { %v2395_v61 = vadd.f32 %v2394_v59, %v2291_v4  ;;  %v7651_v63 = vpop.f32.mrb[15].mxu0 }
 0x52c   :  { %v2484_v3 = vadd.f32 %v2483_v46, %v2395_v61 }
 0x541   :  { %v2689_v5 = vpop.f32.mrb[28].mxu1 }
 0x542   :  { %v7756_v6 = vpop.f32.mrb[29].mxu1 }
 0x549   :  { %v2602_v29 = vpop.f32.mrb[16].mxu0 }
 0x54a   :  { %v2603_v32 = vadd.f32 %v2602_v29, %v2484_v3  ;;  %v7721_v10 = vpop.f32.mrb[17].mxu0  ;;  %v2700_v3 = vpop.permute.xlu0 %2699 }
 0x54c   :  { %v2690_v11 = vadd.f32 %v2689_v5, %v2603_v32  ;;  %v11080_v5 = vld [vmem:[%s11680_s1] ss:$0 sm:$0xff] }
 0x54d   :  { %v2702_v6 = vmul.f32 %v11080_v5, %v2700_v3  ;;  %v11086_v32 = vld [vmem:[%s11681_s2] ss:$0 sm:$0xff] }
 0x54e   :  { %v2693_v35 = vadd.f32 %v2690_v11, %v2051_v33 }
 0x54f   :  { %v2703_v10 = vadd.f32 %v11086_v32, %v2702_v6 }
 0x550   :  { %10131 = vtanh.f32 %v2693_v35 }
 0x55a   :  { %v10132_v14 = vpop.eup %10131 }
 0x55b   :  { %v10963_v51 = vand.u32 4294901760, %v10132_v14 }
 0x55d   :  { %7825 = vmatmul.mubr.f32.vlgmr.msra.gmra.mrb[30].mxu1 %v10963_v51  ;;  %v2786_v52 = vsub.f32 %v10132_v14, %v10963_v51 }
 0x55e   :  { %9457 = vmatpush3.bf16.msra.mxu1 %v10289_v12  ;;  %7894 = vmatprep.mubr.msk.f32.mxu1 %vm10220_vm0, %v10221_v1 }
 0x55f   :  { %9458 = vmatprep.subr.bf16.mxu1 %v10219_v0  ;;  %v2787_v24 = vand.u32 4294901760, %v2786_v52 }
 0x561   :  { %v2788_v53 = vsub.f32 %v2786_v52, %v2787_v24 }
 0x562   :  { %9460 = vmatpush3.bf16.msra.mxu1 %v10292_v13 }
 0x563   :  { %9461 = vmatprep.subr.bf16.mxu1 %v10219_v0  ;;  %v2789_v26 = vand.u32 4294901760, %v2788_v53 }
 0x565   :  { %7790 = vmatmul.mubr.f32.vlgmr.msra.gmra.mrb[18].mxu0 %v2789_v26 }
 0x566   :  { %9433 = vmatpush3.bf16.msra.mxu0 %v10453_v15  ;;  %9463 = vmatpush3.bf16.msra.mxu1 %v10298_v18 }
 0x567   :  { %9434 = vmatprep.subr.bf16.mxu0 %v10219_v0  ;;  %9464 = vmatprep.subr.bf16.mxu1 %v10219_v0 }
 0x568   :  { %7859 = vmatprep.mubr.msk.f32.mxu0 %vm10220_vm0, %v10221_v1 }
 0x56a   :  { %9436 = vmatpush3.bf16.msra.mxu0 %v10460_v20  ;;  %9466 = vmatpush3.bf16.msra.mxu1 %v10304_v30 }
 0x56b   :  { %9437 = vmatprep.subr.bf16.mxu0 %v10219_v0  ;;  %9467 = vmatprep.subr.bf16.mxu1 %v10219_v0 }
 0x56e   :  { %9439 = vmatpush3.bf16.msra.mxu0 %v10468_v38  ;;  %9469 = vmatpush3.bf16.msra.mxu1 %v10316_v41 }
 0x56f   :  { %9440 = vmatprep.subr.bf16.mxu0 %v10219_v0  ;;  %9470 = vmatprep.subr.bf16.mxu1 %v10219_v0 }
 0x572   :  { %9442 = vmatpush3.bf16.msra.mxu0 %v10474_v39  ;;  %9472 = vmatpush3.bf16.msra.mxu1 %v10320_v42 }
 0x573   :  { %9443 = vmatprep.subr.bf16.mxu0 %v10219_v0  ;;  %9473 = vmatprep.subr.bf16.mxu1 %v10219_v0 }
 0x576   :  { %9445 = vmatpush3.bf16.msra.mxu0 %v10480_v40  ;;  %9475 = vmatpush3.bf16.msra.mxu1 %v10322_v43 }
 0x577   :  { %9446 = vmatprep.subr.bf16.mxu0 %v10219_v0  ;;  %9476 = vmatprep.subr.bf16.mxu1 %v10219_v0 }
 0x57a   :  { %9448 = vmatpush3.bf16.msra.mxu0 %v10486_v47  ;;  %9478 = vmatpush3.bf16.msra.mxu1 %v10324_v44 }
 0x57b   :  { %9449 = vmatprep.subr.bf16.mxu0 %v10219_v0  ;;  %9503 = vmatprep.subr.bf16.mxu1 %v10219_v0 }
 0x57d   :  { %7895 = vmatmul.mubr.f32.vlgmr.msra.gmra.mrb[32].mxu1 %v2787_v24 }
 0x57e   :  { %9451 = vmatpush3.bf16.msra.mxu0 %v10492_v48  ;;  %9505 = vmatpush3.bf16.msra.mxu1 %v10289_v12 }
 0x57f   :  { %9452 = vmatprep.subr.bf16.mxu0 %v10219_v0  ;;  %9506 = vmatprep.subr.bf16.mxu1 %v10219_v0 }
 0x580   :  { %7964 = vmatprep.mubr.msk.f32.mxu1 %vm10220_vm0, %v10221_v1 }
 0x582   :  { %9454 = vmatpush3.bf16.msra.mxu0 %v10498_v50  ;;  %9508 = vmatpush3.bf16.msra.mxu1 %v10292_v13 }
 0x583   :  { %9479 = vmatprep.subr.bf16.mxu0 %v10219_v0  ;;  %9509 = vmatprep.subr.bf16.mxu1 %v10219_v0 }
 0x585   :  { %7860 = vmatmul.mubr.f32.vlgmr.msra.gmra.mrb[20].mxu0 %v2786_v52 }
 0x586   :  { %9481 = vmatpush3.bf16.msra.mxu0 %v10379_v16  ;;  %9511 = vmatpush3.bf16.msra.mxu1 %v10298_v18 }
 0x587   :  { %9482 = vmatprep.subr.bf16.mxu0 %v10219_v0  ;;  %9512 = vmatprep.subr.bf16.mxu1 %v10219_v0 }
 0x588   :  { %7929 = vmatprep.mubr.msk.f32.mxu0 %vm10220_vm0, %v10221_v1 }
 0x58a   :  { %9484 = vmatpush3.bf16.msra.mxu0 %v10381_v17  ;;  %9514 = vmatpush3.bf16.msra.mxu1 %v10304_v30 }
 0x58b   :  { %9485 = vmatprep.subr.bf16.mxu0 %v10219_v0  ;;  %9515 = vmatprep.subr.bf16.mxu1 %v10219_v0 }
 0x58e   :  { %9487 = vmatpush3.bf16.msra.mxu0 %v10383_v19  ;;  %9517 = vmatpush3.bf16.msra.mxu1 %v10316_v41 }
 0x58f   :  { %9488 = vmatprep.subr.bf16.mxu0 %v10219_v0  ;;  %9518 = vmatprep.subr.bf16.mxu1 %v10219_v0 }
 0x592   :  { %9490 = vmatpush3.bf16.msra.mxu0 %v10386_v21  ;;  %9520 = vmatpush3.bf16.msra.mxu1 %v10320_v42 }
 0x593   :  { %9491 = vmatprep.subr.bf16.mxu0 %v10219_v0  ;;  %9521 = vmatprep.subr.bf16.mxu1 %v10219_v0 }
 0x596   :  { %9493 = vmatpush3.bf16.msra.mxu0 %v10388_v22  ;;  %9523 = vmatpush3.bf16.msra.mxu1 %v10322_v43 }
 0x597   :  { %9494 = vmatprep.subr.bf16.mxu0 %v10219_v0  ;;  %9524 = vmatprep.subr.bf16.mxu1 %v10219_v0 }
 0x59a   :  { %9496 = vmatpush3.bf16.msra.mxu0 %v10390_v23  ;;  %9526 = vmatpush3.bf16.msra.mxu1 %v10324_v44 }
 0x59b   :  { %9497 = vmatprep.subr.bf16.mxu0 %v10219_v0  ;;  %9551 = vmatprep.subr.bf16.mxu1 %v10219_v0 }
 0x59d   :  { %7965 = vmatmul.mubr.f32.vlgmr.msra.gmra.mrb[34].mxu1 %v10963_v51 }
 0x59e   :  { %9499 = vmatpush3.bf16.msra.mxu0 %v10394_v27  ;;  %9553 = vmatpush3.bf16.msra.mxu1 %v10403_v31 }
 0x59f   :  { %9500 = vmatprep.subr.bf16.mxu0 %v10219_v0  ;;  %9554 = vmatprep.subr.bf16.mxu1 %v10219_v0 }
 0x5a0   :  { %8034 = vmatprep.mubr.msk.f32.mxu1 %vm10220_vm0, %v10221_v1 }
 0x5a2   :  { %9502 = vmatpush3.bf16.msra.mxu0 %v10398_v28  ;;  %9556 = vmatpush3.bf16.msra.mxu1 %v10413_v37 }
 0x5a3   :  { %9527 = vmatprep.subr.bf16.mxu0 %v10219_v0  ;;  %9557 = vmatprep.subr.bf16.mxu1 %v10219_v0 }
 0x5a5   :  { %7930 = vmatmul.mubr.f32.vlgmr.msra.gmra.mrb[22].mxu0 %v10963_v51 }
 0x5a6   :  { %9529 = vmatpush3.bf16.msra.mxu0 %v10289_v12  ;;  %9559 = vmatpush3.bf16.msra.mxu1 %v10419_v60 }
 0x5a7   :  { %9530 = vmatprep.subr.bf16.mxu0 %v10219_v0  ;;  %9560 = vmatprep.subr.bf16.mxu1 %v10219_v0 }
 0x5a8   :  { %7999 = vmatprep.mubr.msk.f32.mxu0 %vm10220_vm0, %v10221_v1 }
 0x5aa   :  { %9532 = vmatpush3.bf16.msra.mxu0 %v10292_v13  ;;  %9562 = vmatpush3.bf16.msra.mxu1 %v10424_v2 }
 0x5ab   :  { %9533 = vmatprep.subr.bf16.mxu0 %v10219_v0  ;;  %9563 = vmatprep.subr.bf16.mxu1 %v10219_v0 }
 0x5ae   :  { %9535 = vmatpush3.bf16.msra.mxu0 %v10298_v18  ;;  %9565 = vmatpush3.bf16.msra.mxu1 %v10432_v7 }
 0x5af   :  { %9536 = vmatprep.subr.bf16.mxu0 %v10219_v0  ;;  %9566 = vmatprep.subr.bf16.mxu1 %v10219_v0 }
 0x5b2   :  { %9538 = vmatpush3.bf16.msra.mxu0 %v10304_v30  ;;  %9568 = vmatpush3.bf16.msra.mxu1 %v10437_v9 }
 0x5b3   :  { %9539 = vmatprep.subr.bf16.mxu0 %v10219_v0  ;;  %9569 = vmatprep.subr.bf16.mxu1 %v10219_v0 }
 0x5b6   :  { %9541 = vmatpush3.bf16.msra.mxu0 %v10316_v41  ;;  %9571 = vmatpush3.bf16.msra.mxu1 %v10443_v34 }
 0x5b7   :  { %9542 = vmatprep.subr.bf16.mxu0 %v10219_v0  ;;  %9572 = vmatprep.subr.bf16.mxu1 %v10219_v0 }
 0x5ba   :  { %9544 = vmatpush3.bf16.msra.mxu0 %v10320_v42  ;;  %9574 = vmatpush3.bf16.msra.mxu1 %v10447_v36 }
 0x5bb   :  { %9545 = vmatprep.subr.bf16.mxu0 %v10219_v0  ;;  %9599 = vmatprep.subr.bf16.mxu1 %v10219_v0 }
 0x5be   :  { %9547 = vmatpush3.bf16.msra.mxu0 %v10322_v43 }
 0x5bf   :  { %9548 = vmatprep.subr.bf16.mxu0 %v10219_v0 }
 0x5c2   :  { %9550 = vmatpush3.bf16.msra.mxu0 %v10324_v44 }
 0x5c3   :  { %9575 = vmatprep.subr.bf16.mxu0 %v10219_v0 }
 0x630   :  { %v2942_v54 = vpop.f32.mrb[30].mxu1 }
 0x631   :  { %v7826_v55 = vpop.f32.mrb[31].mxu1 }
 0x638   :  { %v2791_v56 = vpop.f32.mrb[18].mxu0 }
 0x639   :  { %v2943_v57 = vadd.f32 %v2942_v54, %v2791_v56  ;;  %v7791_v58 = vpop.f32.mrb[19].mxu0 }
 0x650   :  { %v3135_v62 = vpop.f32.mrb[32].mxu1 }
 0x651   :  { %v7896_v4 = vpop.f32.mrb[33].mxu1 }
 0x658   :  { %v3046_v45 = vpop.f32.mrb[20].mxu0 }
 0x659   :  { %v3047_v46 = vadd.f32 %v3046_v45, %v2943_v57  ;;  %v7861_v49 = vpop.f32.mrb[21].mxu0 }
 0x65b   :  { %v3136_v59 = vadd.f32 %v3135_v62, %v3047_v46 }
 0x670   :  { %v3341_v61 = vpop.f32.mrb[34].mxu1 }
 0x671   :  { %v7966_v63 = vpop.f32.mrb[35].mxu1 }
 0x672   :  { %v3352_v63 = vpop.permute.xlu1 %3351 }
 0x673   :  { %v3354_v3 = vmul.f32 %v11080_v5, %v3352_v63 }
 0x678   :  { %v3254_v25 = vpop.f32.mrb[22].mxu0 }
 0x679   :  { %v3255_v8 = vadd.f32 %v3254_v25, %v3136_v59  ;;  %v7931_v29 = vpop.f32.mrb[23].mxu0 }
 0x67a   :  { %v3355_v29 = vadd.f32 %v11086_v32, %v3354_v3 }
 0x67b   :  { %v3342_v33 = vadd.f32 %v3341_v61, %v3255_v8 }
 0x67d   :  { %v3345_v11 = vadd.f32 %v3342_v33, %v2703_v10 }
 0x67f   :  { %10133 = vtanh.f32 %v3345_v11 }
 0x689   :  { %v10134_v35 = vpop.eup %10133 }
 0x68a   :  { %v11089_v14 = vand.u32 4294901760, %v10134_v35 }
 0x68c   :  { %8035 = vmatmul.mubr.f32.vlgmr.msra.gmra.mrb[36].mxu1 %v11089_v14  ;;  %v3438_v51 = vsub.f32 %v10134_v35, %v11089_v14 }
 0x68d   :  { %9601 = vmatpush3.bf16.msra.mxu1 %v10289_v12  ;;  %8104 = vmatprep.mubr.msk.f32.mxu1 %vm10220_vm0, %v10221_v1 }
 0x68e   :  { %9602 = vmatprep.subr.bf16.mxu1 %v10219_v0  ;;  %v3439_v52 = vand.u32 4294901760, %v3438_v51 }
 0x690   :  { %v3440_v24 = vsub.f32 %v3438_v51, %v3439_v52 }
 0x691   :  { %9604 = vmatpush3.bf16.msra.mxu1 %v10292_v13 }
 0x692   :  { %9605 = vmatprep.subr.bf16.mxu1 %v10219_v0  ;;  %v3441_v53 = vand.u32 4294901760, %v3440_v24 }
 0x694   :  { %8000 = vmatmul.mubr.f32.vlgmr.msra.gmra.mrb[24].mxu0 %v3441_v53 }
 0x695   :  { %9577 = vmatpush3.bf16.msra.mxu0 %v10453_v15  ;;  %9607 = vmatpush3.bf16.msra.mxu1 %v10298_v18 }
 0x696   :  { %9578 = vmatprep.subr.bf16.mxu0 %v10219_v0  ;;  %9608 = vmatprep.subr.bf16.mxu1 %v10219_v0 }
 0x697   :  { %8069 = vmatprep.mubr.msk.f32.mxu0 %vm10220_vm0, %v10221_v1 }
 0x699   :  { %9580 = vmatpush3.bf16.msra.mxu0 %v10460_v20  ;;  %9610 = vmatpush3.bf16.msra.mxu1 %v10304_v30 }
 0x69a   :  { %9581 = vmatprep.subr.bf16.mxu0 %v10219_v0  ;;  %9611 = vmatprep.subr.bf16.mxu1 %v10219_v0 }
 0x69d   :  { %9583 = vmatpush3.bf16.msra.mxu0 %v10468_v38  ;;  %9613 = vmatpush3.bf16.msra.mxu1 %v10316_v41 }
 0x69e   :  { %9584 = vmatprep.subr.bf16.mxu0 %v10219_v0  ;;  %9614 = vmatprep.subr.bf16.mxu1 %v10219_v0 }
 0x6a1   :  { %9586 = vmatpush3.bf16.msra.mxu0 %v10474_v39  ;;  %9616 = vmatpush3.bf16.msra.mxu1 %v10320_v42 }
 0x6a2   :  { %9587 = vmatprep.subr.bf16.mxu0 %v10219_v0  ;;  %9617 = vmatprep.subr.bf16.mxu1 %v10219_v0 }
 0x6a5   :  { %9589 = vmatpush3.bf16.msra.mxu0 %v10480_v40  ;;  %9619 = vmatpush3.bf16.msra.mxu1 %v10322_v43 }
 0x6a6   :  { %9590 = vmatprep.subr.bf16.mxu0 %v10219_v0  ;;  %9620 = vmatprep.subr.bf16.mxu1 %v10219_v0 }
 0x6a9   :  { %9592 = vmatpush3.bf16.msra.mxu0 %v10486_v47  ;;  %9622 = vmatpush3.bf16.msra.mxu1 %v10324_v44 }
 0x6aa   :  { %9593 = vmatprep.subr.bf16.mxu0 %v10219_v0  ;;  %9647 = vmatprep.subr.bf16.mxu1 %v10219_v0 }
 0x6ac   :  { %8105 = vmatmul.mubr.f32.vlgmr.msra.gmra.mrb[38].mxu1 %v3439_v52 }
 0x6ad   :  { %9595 = vmatpush3.bf16.msra.mxu0 %v10492_v48  ;;  %9649 = vmatpush3.bf16.msra.mxu1 %v10289_v12 }
 0x6ae   :  { %9596 = vmatprep.subr.bf16.mxu0 %v10219_v0  ;;  %9650 = vmatprep.subr.bf16.mxu1 %v10219_v0 }
 0x6af   :  { %8174 = vmatprep.mubr.msk.f32.mxu1 %vm10220_vm0, %v10221_v1 }
 0x6b1   :  { %9598 = vmatpush3.bf16.msra.mxu0 %v10498_v50  ;;  %9652 = vmatpush3.bf16.msra.mxu1 %v10292_v13 }
 0x6b2   :  { %9623 = vmatprep.subr.bf16.mxu0 %v10219_v0  ;;  %9653 = vmatprep.subr.bf16.mxu1 %v10219_v0 }
 0x6b4   :  { %8070 = vmatmul.mubr.f32.vlgmr.msra.gmra.mrb[26].mxu0 %v3438_v51 }
 0x6b5   :  { %9625 = vmatpush3.bf16.msra.mxu0 %v10379_v16  ;;  %9655 = vmatpush3.bf16.msra.mxu1 %v10298_v18 }
 0x6b6   :  { %9626 = vmatprep.subr.bf16.mxu0 %v10219_v0  ;;  %9656 = vmatprep.subr.bf16.mxu1 %v10219_v0 }
 0x6b7   :  { %8139 = vmatprep.mubr.msk.f32.mxu0 %vm10220_vm0, %v10221_v1 }
 0x6b9   :  { %9628 = vmatpush3.bf16.msra.mxu0 %v10381_v17  ;;  %9658 = vmatpush3.bf16.msra.mxu1 %v10304_v30 }
 0x6ba   :  { %9629 = vmatprep.subr.bf16.mxu0 %v10219_v0  ;;  %9659 = vmatprep.subr.bf16.mxu1 %v10219_v0 }
 0x6bd   :  { %9631 = vmatpush3.bf16.msra.mxu0 %v10383_v19  ;;  %9661 = vmatpush3.bf16.msra.mxu1 %v10316_v41 }
 0x6be   :  { %9632 = vmatprep.subr.bf16.mxu0 %v10219_v0  ;;  %9662 = vmatprep.subr.bf16.mxu1 %v10219_v0 }
 0x6c1   :  { %9634 = vmatpush3.bf16.msra.mxu0 %v10386_v21  ;;  %9664 = vmatpush3.bf16.msra.mxu1 %v10320_v42 }
 0x6c2   :  { %9635 = vmatprep.subr.bf16.mxu0 %v10219_v0  ;;  %9665 = vmatprep.subr.bf16.mxu1 %v10219_v0 }
 0x6c5   :  { %9637 = vmatpush3.bf16.msra.mxu0 %v10388_v22  ;;  %9667 = vmatpush3.bf16.msra.mxu1 %v10322_v43 }
 0x6c6   :  { %9638 = vmatprep.subr.bf16.mxu0 %v10219_v0  ;;  %9668 = vmatprep.subr.bf16.mxu1 %v10219_v0 }
 0x6c9   :  { %9640 = vmatpush3.bf16.msra.mxu0 %v10390_v23  ;;  %9670 = vmatpush3.bf16.msra.mxu1 %v10324_v44 }
 0x6ca   :  { %9641 = vmatprep.subr.bf16.mxu0 %v10219_v0  ;;  %9695 = vmatprep.subr.bf16.mxu1 %v10219_v0 }
 0x6cc   :  { %8175 = vmatmul.mubr.f32.vlgmr.msra.gmra.mrb[40].mxu1 %v11089_v14 }
 0x6cd   :  { %9643 = vmatpush3.bf16.msra.mxu0 %v10394_v27  ;;  %9697 = vmatpush3.bf16.msra.mxu1 %v10403_v31 }
 0x6ce   :  { %9644 = vmatprep.subr.bf16.mxu0 %v10219_v0  ;;  %9698 = vmatprep.subr.bf16.mxu1 %v10219_v0 }
 0x6cf   :  { %8244 = vmatprep.mubr.msk.f32.mxu1 %vm10220_vm0, %v10221_v1 }
 0x6d1   :  { %9646 = vmatpush3.bf16.msra.mxu0 %v10398_v28  ;;  %9700 = vmatpush3.bf16.msra.mxu1 %v10413_v37 }
 0x6d2   :  { %9671 = vmatprep.subr.bf16.mxu0 %v10219_v0  ;;  %9701 = vmatprep.subr.bf16.mxu1 %v10219_v0 }
 0x6d4   :  { %8140 = vmatmul.mubr.f32.vlgmr.msra.gmra.mrb[28].mxu0 %v11089_v14 }
 0x6d5   :  { %9673 = vmatpush3.bf16.msra.mxu0 %v10289_v12  ;;  %9703 = vmatpush3.bf16.msra.mxu1 %v10419_v60 }
 0x6d6   :  { %9674 = vmatprep.subr.bf16.mxu0 %v10219_v0  ;;  %9704 = vmatprep.subr.bf16.mxu1 %v10219_v0 }
 0x6d7   :  { %8209 = vmatprep.mubr.msk.f32.mxu0 %vm10220_vm0, %v10221_v1 }
 0x6d9   :  { %9676 = vmatpush3.bf16.msra.mxu0 %v10292_v13  ;;  %9706 = vmatpush3.bf16.msra.mxu1 %v10424_v2 }
 0x6da   :  { %9677 = vmatprep.subr.bf16.mxu0 %v10219_v0  ;;  %9707 = vmatprep.subr.bf16.mxu1 %v10219_v0 }
 0x6dd   :  { %9679 = vmatpush3.bf16.msra.mxu0 %v10298_v18  ;;  %9709 = vmatpush3.bf16.msra.mxu1 %v10432_v7 }
 0x6de   :  { %9680 = vmatprep.subr.bf16.mxu0 %v10219_v0  ;;  %9710 = vmatprep.subr.bf16.mxu1 %v10219_v0 }
 0x6e1   :  { %9682 = vmatpush3.bf16.msra.mxu0 %v10304_v30  ;;  %9712 = vmatpush3.bf16.msra.mxu1 %v10437_v9 }
 0x6e2   :  { %9683 = vmatprep.subr.bf16.mxu0 %v10219_v0  ;;  %9713 = vmatprep.subr.bf16.mxu1 %v10219_v0 }
 0x6e5   :  { %9685 = vmatpush3.bf16.msra.mxu0 %v10316_v41  ;;  %9715 = vmatpush3.bf16.msra.mxu1 %v10443_v34 }
 0x6e6   :  { %9686 = vmatprep.subr.bf16.mxu0 %v10219_v0  ;;  %9716 = vmatprep.subr.bf16.mxu1 %v10219_v0 }
 0x6e9   :  { %9688 = vmatpush3.bf16.msra.mxu0 %v10320_v42  ;;  %9718 = vmatpush3.bf16.msra.mxu1 %v10447_v36 }
 0x6ea   :  { %9689 = vmatprep.subr.bf16.mxu0 %v10219_v0  ;;  %9743 = vmatprep.subr.bf16.mxu1 %v10219_v0 }
 0x6ed   :  { %9691 = vmatpush3.bf16.msra.mxu0 %v10322_v43 }
 0x6ee   :  { %9692 = vmatprep.subr.bf16.mxu0 %v10219_v0 }
 0x6f1   :  { %9694 = vmatpush3.bf16.msra.mxu0 %v10324_v44 }
 0x6f2   :  { %9719 = vmatprep.subr.bf16.mxu0 %v10219_v0 }
 0x75f   :  { %v3594_v26 = vpop.f32.mrb[36].mxu1 }
 0x760   :  { %v8036_v54 = vpop.f32.mrb[37].mxu1 }
 0x767   :  { %v3443_v55 = vpop.f32.mrb[24].mxu0 }
 0x768   :  { %v3595_v56 = vadd.f32 %v3594_v26, %v3443_v55  ;;  %v8001_v57 = vpop.f32.mrb[25].mxu0 }
 0x769   :  { %v4004_v57 = vpop.permute.xlu0 %4003 }
 0x77f   :  { %v3787_v58 = vpop.f32.mrb[38].mxu1 }
 0x780   :  { %v8106_v62 = vpop.f32.mrb[39].mxu1 }
 0x787   :  { %v3698_v4 = vpop.f32.mrb[26].mxu0 }
 0x788   :  { %v3699_v45 = vadd.f32 %v3698_v4, %v3595_v56  ;;  %v8071_v46 = vpop.f32.mrb[27].mxu0 }
 0x78a   :  { %v3788_v49 = vadd.f32 %v3787_v58, %v3699_v45  ;;  %v4006_v58 = vmul.f32 %v11080_v5, %v4004_v57 }
 0x78c   :  { %v4007_v46 = vadd.f32 %v11086_v32, %v4006_v58 }
 0x79f   :  { %v3993_v59 = vpop.f32.mrb[40].mxu1 }
 0x7a0   :  { %v8176_v61 = vpop.f32.mrb[41].mxu1 }
 0x7a7   :  { %v3906_v6 = vpop.f32.mrb[28].mxu0 }
 0x7a8   :  { %v3907_v25 = vadd.f32 %v3906_v6, %v3788_v49  ;;  %v8141_v8 = vpop.f32.mrb[29].mxu0 }
 0x7aa   :  { %v3994_v10 = vadd.f32 %v3993_v59, %v3907_v25 }
 0x7ac   :  { %v3997_v33 = vadd.f32 %v3994_v10, %v3355_v29 }
 0x7ae   :  { %10135 = vtanh.f32 %v3997_v33 }
 0x7b8   :  { %v10136_v11 = vpop.eup %10135 }
 0x7b9   :  { %v11205_v35 = vand.u32 4294901760, %v10136_v11 }
 0x7bb   :  { %8245 = vmatmul.mubr.f32.vlgmr.msra.gmra.mrb[42].mxu1 %v11205_v35  ;;  %v4090_v14 = vsub.f32 %v10136_v11, %v11205_v35  ;;  %v5318_v11 = vld [vmem:[#allocation6 + $0x50] sm:$0xff] }
 0x7bc   :  { %9745 = vmatpush3.bf16.msra.mxu1 %v10289_v12  ;;  %8314 = vmatprep.mubr.msk.f32.mxu1 %vm10220_vm0, %v10221_v1 }
 0x7bd   :  { %9746 = vmatprep.subr.bf16.mxu1 %v10219_v0  ;;  %v4091_v51 = vand.u32 4294901760, %v4090_v14 }
 0x7bf   :  { %v4092_v52 = vsub.f32 %v4090_v14, %v4091_v51 }
 0x7c0   :  { %9748 = vmatpush3.bf16.msra.mxu1 %v10292_v13 }
 0x7c1   :  { %9749 = vmatprep.subr.bf16.mxu1 %v10219_v0  ;;  %v4093_v24 = vand.u32 4294901760, %v4092_v52 }
 0x7c3   :  { %8210 = vmatmul.mubr.f32.vlgmr.msra.gmra.mrb[30].mxu0 %v4093_v24  ;;  %v5320_v24 = vld [vmem:[#allocation6 + $0x60] sm:$0xff] }
 0x7c4   :  { %9721 = vmatpush3.bf16.msra.mxu0 %v10453_v15  ;;  %9751 = vmatpush3.bf16.msra.mxu1 %v10298_v18 }
 0x7c5   :  { %9722 = vmatprep.subr.bf16.mxu0 %v10219_v0  ;;  %9752 = vmatprep.subr.bf16.mxu1 %v10219_v0 }
 0x7c6   :  { %8279 = vmatprep.mubr.msk.f32.mxu0 %vm10220_vm0, %v10221_v1 }
 0x7c8   :  { %9724 = vmatpush3.bf16.msra.mxu0 %v10460_v20  ;;  %9754 = vmatpush3.bf16.msra.mxu1 %v10304_v30 }
 0x7c9   :  { %9725 = vmatprep.subr.bf16.mxu0 %v10219_v0  ;;  %9755 = vmatprep.subr.bf16.mxu1 %v10219_v0 }
 0x7cc   :  { %9727 = vmatpush3.bf16.msra.mxu0 %v10468_v38  ;;  %9757 = vmatpush3.bf16.msra.mxu1 %v10316_v41 }
 0x7cd   :  { %9728 = vmatprep.subr.bf16.mxu0 %v10219_v0  ;;  %9758 = vmatprep.subr.bf16.mxu1 %v10219_v0 }
 0x7d0   :  { %9730 = vmatpush3.bf16.msra.mxu0 %v10474_v39  ;;  %9760 = vmatpush3.bf16.msra.mxu1 %v10320_v42 }
 0x7d1   :  { %9731 = vmatprep.subr.bf16.mxu0 %v10219_v0  ;;  %9761 = vmatprep.subr.bf16.mxu1 %v10219_v0 }
 0x7d4   :  { %9733 = vmatpush3.bf16.msra.mxu0 %v10480_v40  ;;  %9763 = vmatpush3.bf16.msra.mxu1 %v10322_v43 }
 0x7d5   :  { %9734 = vmatprep.subr.bf16.mxu0 %v10219_v0  ;;  %9764 = vmatprep.subr.bf16.mxu1 %v10219_v0 }
 0x7d8   :  { %9736 = vmatpush3.bf16.msra.mxu0 %v10486_v47  ;;  %9766 = vmatpush3.bf16.msra.mxu1 %v10324_v44 }
 0x7d9   :  { %9737 = vmatprep.subr.bf16.mxu0 %v10219_v0  ;;  %9791 = vmatprep.subr.bf16.mxu1 %v10219_v0 }
 0x7db   :  { %8315 = vmatmul.mubr.f32.vlgmr.msra.gmra.mrb[44].mxu1 %v4091_v51 }
 0x7dc   :  { %9739 = vmatpush3.bf16.msra.mxu0 %v10492_v48  ;;  %9793 = vmatpush3.bf16.msra.mxu1 %v10289_v12 }
 0x7dd   :  { %9740 = vmatprep.subr.bf16.mxu0 %v10219_v0  ;;  %9794 = vmatprep.subr.bf16.mxu1 %v10219_v0 }
 0x7de   :  { %8384 = vmatprep.mubr.msk.f32.mxu1 %vm10220_vm0, %v10221_v1 }
 0x7e0   :  { %9742 = vmatpush3.bf16.msra.mxu0 %v10498_v50  ;;  %9796 = vmatpush3.bf16.msra.mxu1 %v10292_v13 }
 0x7e1   :  { %9767 = vmatprep.subr.bf16.mxu0 %v10219_v0  ;;  %9797 = vmatprep.subr.bf16.mxu1 %v10219_v0 }
 0x7e3   :  { %8280 = vmatmul.mubr.f32.vlgmr.msra.gmra.mrb[32].mxu0 %v4090_v14  ;;  %v5362_v14 = vand.u32 4294901760, %v5318_v11 }
 0x7e4   :  { %9769 = vmatpush3.bf16.msra.mxu0 %v10379_v16  ;;  %9799 = vmatpush3.bf16.msra.mxu1 %v10298_v18 }
 0x7e5   :  { %9770 = vmatprep.subr.bf16.mxu0 %v10219_v0  ;;  %9800 = vmatprep.subr.bf16.mxu1 %v10219_v0  ;;  %v11444_v57 = vsub.f32 %v5318_v11, %v5362_v14 }
 0x7e6   :  { %8349 = vmatprep.mubr.msk.f32.mxu0 %vm10220_vm0, %v10221_v1 }
 0x7e8   :  { %9772 = vmatpush3.bf16.msra.mxu0 %v10381_v17  ;;  %9802 = vmatpush3.bf16.msra.mxu1 %v10304_v30 }
 0x7e9   :  { %9773 = vmatprep.subr.bf16.mxu0 %v10219_v0  ;;  %9803 = vmatprep.subr.bf16.mxu1 %v10219_v0 }
 0x7ec   :  { %9775 = vmatpush3.bf16.msra.mxu0 %v10383_v19  ;;  %9805 = vmatpush3.bf16.msra.mxu1 %v10316_v41 }
 0x7ed   :  { %9776 = vmatprep.subr.bf16.mxu0 %v10219_v0  ;;  %9806 = vmatprep.subr.bf16.mxu1 %v10219_v0 }
 0x7f0   :  { %9778 = vmatpush3.bf16.msra.mxu0 %v10386_v21  ;;  %9808 = vmatpush3.bf16.msra.mxu1 %v10320_v42 }
 0x7f1   :  { %9779 = vmatprep.subr.bf16.mxu0 %v10219_v0  ;;  %9809 = vmatprep.subr.bf16.mxu1 %v10219_v0 }
 0x7f4   :  { %9781 = vmatpush3.bf16.msra.mxu0 %v10388_v22  ;;  %9811 = vmatpush3.bf16.msra.mxu1 %v10322_v43 }
 0x7f5   :  { %9782 = vmatprep.subr.bf16.mxu0 %v10219_v0  ;;  %9812 = vmatprep.subr.bf16.mxu1 %v10219_v0 }
 0x7f8   :  { %9784 = vmatpush3.bf16.msra.mxu0 %v10390_v23  ;;  %9814 = vmatpush3.bf16.msra.mxu1 %v10324_v44 }
 0x7f9   :  { %9785 = vmatprep.subr.bf16.mxu0 %v10219_v0  ;;  %9839 = vmatprep.subr.bf16.mxu1 %v10219_v0 }
 0x7fb   :  { %8385 = vmatmul.mubr.f32.vlgmr.msra.gmra.mrb[46].mxu1 %v11205_v35 }
 0x7fc   :  { %9787 = vmatpush3.bf16.msra.mxu0 %v10394_v27  ;;  %9841 = vmatpush3.bf16.msra.mxu1 %v10403_v31 }
 0x7fd   :  { %9788 = vmatprep.subr.bf16.mxu0 %v10219_v0  ;;  %9842 = vmatprep.subr.bf16.mxu1 %v10219_v0 }
 0x7fe   :  { %8454 = vmatprep.mubr.msk.f32.mxu1 %vm10220_vm0, %v10221_v1 }
 0x800   :  { %9790 = vmatpush3.bf16.msra.mxu0 %v10398_v28  ;;  %9844 = vmatpush3.bf16.msra.mxu1 %v10413_v37 }
 0x801   :  { %9815 = vmatprep.subr.bf16.mxu0 %v10219_v0  ;;  %9845 = vmatprep.subr.bf16.mxu1 %v10219_v0 }
 0x803   :  { %8350 = vmatmul.mubr.f32.vlgmr.msra.gmra.mrb[34].mxu0 %v11205_v35  ;;  %v5319_v35 = vld [vmem:[#allocation6 + $0x58] sm:$0xff] }
 0x804   :  { %9817 = vmatpush3.bf16.msra.mxu0 %v10289_v12  ;;  %9847 = vmatpush3.bf16.msra.mxu1 %v10419_v60  ;;  %v5365_v51 = vand.u32 4294901760, %v5319_v35 }
 0x805   :  { %9818 = vmatprep.subr.bf16.mxu0 %v10219_v0  ;;  %9848 = vmatprep.subr.bf16.mxu1 %v10219_v0 }
 0x806   :  { %8419 = vmatprep.mubr.msk.f32.mxu0 %vm10220_vm0, %v10221_v1  ;;  %v11424_v52 = vpack.c.bf16 %v5365_v51, %v5362_v14  ;;  %v11446_v58 = vsub.f32 %v5319_v35, %v5365_v51 }
 0x808   :  { %9820 = vmatpush3.bf16.msra.mxu0 %v10292_v13  ;;  %9850 = vmatpush3.bf16.msra.mxu1 %v10424_v2 }
 0x809   :  { %9821 = vmatprep.subr.bf16.mxu0 %v10219_v0  ;;  %9851 = vmatprep.subr.bf16.mxu1 %v10219_v0 }
 0x80c   :  { %9823 = vmatpush3.bf16.msra.mxu0 %v10298_v18  ;;  %9853 = vmatpush3.bf16.msra.mxu1 %v10432_v7 }
 0x80d   :  { %9824 = vmatprep.subr.bf16.mxu0 %v10219_v0  ;;  %9854 = vmatprep.subr.bf16.mxu1 %v10219_v0 }
 0x810   :  { %9826 = vmatpush3.bf16.msra.mxu0 %v10304_v30  ;;  %9856 = vmatpush3.bf16.msra.mxu1 %v10437_v9 }
 0x811   :  { %9827 = vmatprep.subr.bf16.mxu0 %v10219_v0  ;;  %9857 = vmatprep.subr.bf16.mxu1 %v10219_v0 }
 0x814   :  { %9829 = vmatpush3.bf16.msra.mxu0 %v10316_v41  ;;  %9859 = vmatpush3.bf16.msra.mxu1 %v10443_v34 }
 0x815   :  { %9830 = vmatprep.subr.bf16.mxu0 %v10219_v0  ;;  %9860 = vmatprep.subr.bf16.mxu1 %v10219_v0 }
 0x818   :  { %9832 = vmatpush3.bf16.msra.mxu0 %v10320_v42  ;;  %9862 = vmatpush3.bf16.msra.mxu1 %v10447_v36 }
 0x819   :  { %9833 = vmatprep.subr.bf16.mxu0 %v10219_v0  ;;  %9887 = vmatprep.subr.bf16.mxu1 %v10219_v0 }
 0x81c   :  { %9835 = vmatpush3.bf16.msra.mxu0 %v10322_v43 }
 0x81d   :  { %9836 = vmatprep.subr.bf16.mxu0 %v10219_v0 }
 0x820   :  { %9838 = vmatpush3.bf16.msra.mxu0 %v10324_v44 }
 0x821   :  { %9863 = vmatprep.subr.bf16.mxu0 %v10219_v0 }
 0x88e   :  { %v4246_v31 = vpop.f32.mrb[42].mxu1 }
 0x88f   :  { %v8246_v37 = vpop.f32.mrb[43].mxu1 }
 0x890   :  { %v5368_v37 = vand.u32 4294901760, %v5320_v24 }
 0x896   :  { %v4095_v60 = vpop.f32.mrb[30].mxu0 }
 0x897   :  { %v4247_v2 = vadd.f32 %v4246_v31, %v4095_v60  ;;  %v8211_v7 = vpop.f32.mrb[31].mxu0  ;;  %v5321_v31 = vld [vmem:[#allocation6 + $0x68] sm:$0xff] }
 0x898   :  { %v5371_v60 = vand.u32 4294901760, %v5321_v31 }
 0x8ae   :  { %v4439_v9 = vpop.f32.mrb[44].mxu1 }
 0x8af   :  { %v8316_v34 = vpop.f32.mrb[45].mxu1 }
 0x8b6   :  { %v4350_v36 = vpop.f32.mrb[32].mxu0 }
 0x8b7   :  { %v4351_v53 = vadd.f32 %v4350_v36, %v4247_v2  ;;  %v8281_v26 = vpop.f32.mrb[33].mxu0  ;;  %v5322_v36 = vld [vmem:[#allocation6 + $0x70] sm:$0xff] }
 0x8b9   :  { %v4440_v54 = vadd.f32 %v4439_v9, %v4351_v53  ;;  %v5323_v53 = vld [vmem:[#allocation6 + $0x78] sm:$0xff] }
 0x8ce   :  { %v4645_v55 = vpop.f32.mrb[46].mxu1 }
 0x8cf   :  { %v8386_v56 = vpop.f32.mrb[47].mxu1 }
 0x8d6   :  { %v4558_v62 = vpop.f32.mrb[34].mxu0 }
 0x8d7   :  { %v4559_v4 = vadd.f32 %v4558_v62, %v4440_v54  ;;  %v8351_v45 = vpop.f32.mrb[35].mxu0  ;;  %v11448_v62 = vpack.c.bf16 %v5371_v60, %v5368_v37 }
 0x8d8   :  { %v11452_v45 = vsub.f32 %v5321_v31, %v5371_v60 }
 0x8d9   :  { %v4646_v49 = vadd.f32 %v4645_v55, %v4559_v4  ;;  %v11450_v4 = vsub.f32 %v5320_v24, %v5368_v37 }
 0x8db   :  { %v4649_v59 = vadd.f32 %v4646_v49, %v4007_v46  ;;  %v5374_v46 = vand.u32 4294901760, %v5322_v36  ;;  %v5377_v49 = vand.u32 4294901760, %v5323_v53 }
 0x8dd   :  { %10137 = vtanh.f32 %v4649_v59 }
 0x8e7   :  { %v10138_v61 = vpop.eup %10137 }
 0x8e8   :  { %v11321_v63 = vand.u32 4294901760, %v10138_v61 }
 0x8ea   :  { %8455 = vmatmul.mubr.f32.vlgmr.msra.gmra.mrb[48].mxu1 %v11321_v63  ;;  %v4742_v3 = vsub.f32 %v10138_v61, %v11321_v63 }
 0x8eb   :  { %9889 = vmatpush3.bf16.msra.mxu1 %v10289_v12  ;;  %8524 = vmatprep.mubr.msk.f32.mxu1 %vm10220_vm0, %v10221_v1 }
 0x8ec   :  { %9890 = vmatprep.subr.bf16.mxu1 %v10219_v0  ;;  %v4743_v6 = vand.u32 4294901760, %v4742_v3 }
 0x8ee   :  { %v4744_v25 = vsub.f32 %v4742_v3, %v4743_v6 }
 0x8ef   :  { %9892 = vmatpush3.bf16.msra.mxu1 %v10292_v13 }
 0x8f0   :  { %9893 = vmatprep.subr.bf16.mxu1 %v10219_v0  ;;  %v4745_v8 = vand.u32 4294901760, %v4744_v25 }
 0x8f2   :  { %8420 = vmatmul.mubr.f32.vlgmr.msra.gmra.mrb[36].mxu0 %v4745_v8 }
 0x8f3   :  { %9865 = vmatpush3.bf16.msra.mxu0 %v10453_v15  ;;  %9895 = vmatpush3.bf16.msra.mxu1 %v10298_v18 }
 0x8f4   :  { %9866 = vmatprep.subr.bf16.mxu0 %v10219_v0  ;;  %9896 = vmatprep.subr.bf16.mxu1 %v10219_v0 }
 0x8f5   :  { %8489 = vmatprep.mubr.msk.f32.mxu0 %vm10220_vm0, %v10221_v1 }
 0x8f7   :  { %9868 = vmatpush3.bf16.msra.mxu0 %v10460_v20  ;;  %9898 = vmatpush3.bf16.msra.mxu1 %v10304_v30  ;;  %v5314_v20 = vld [vmem:[#allocation6 + $0x30] sm:$0xff] }
 0x8f8   :  { %9869 = vmatprep.subr.bf16.mxu0 %v10219_v0  ;;  %9899 = vmatprep.subr.bf16.mxu1 %v10219_v0 }
 0x8fb   :  { %9871 = vmatpush3.bf16.msra.mxu0 %v10468_v38  ;;  %9901 = vmatpush3.bf16.msra.mxu1 %v10316_v41  ;;  %v5315_v38 = vld [vmem:[#allocation6 + $0x38] sm:$0xff] }
 0x8fc   :  { %9872 = vmatprep.subr.bf16.mxu0 %v10219_v0  ;;  %9902 = vmatprep.subr.bf16.mxu1 %v10219_v0 }
 0x8ff   :  { %9874 = vmatpush3.bf16.msra.mxu0 %v10474_v39  ;;  %9904 = vmatpush3.bf16.msra.mxu1 %v10320_v42  ;;  %v5350_v39 = vand.u32 4294901760, %v5314_v20 }
 0x900   :  { %9875 = vmatprep.subr.bf16.mxu0 %v10219_v0  ;;  %9905 = vmatprep.subr.bf16.mxu1 %v10219_v0 }
 0x901   :  { %v11436_v26 = vsub.f32 %v5314_v20, %v5350_v39 }
 0x903   :  { %9877 = vmatpush3.bf16.msra.mxu0 %v10480_v40  ;;  %9907 = vmatpush3.bf16.msra.mxu1 %v10322_v43  ;;  %v5353_v40 = vand.u32 4294901760, %v5315_v38 }
 0x904   :  { %9878 = vmatprep.subr.bf16.mxu0 %v10219_v0  ;;  %9908 = vmatprep.subr.bf16.mxu1 %v10219_v0 }
 0x905   :  { %v11438_v54 = vsub.f32 %v5315_v38, %v5353_v40 }
 0x907   :  { %9880 = vmatpush3.bf16.msra.mxu0 %v10486_v47  ;;  %9910 = vmatpush3.bf16.msra.mxu1 %v10324_v44  ;;  %v11416_v47 = vpack.c.bf16 %v5353_v40, %v5350_v39 }
 0x908   :  { %9881 = vmatprep.subr.bf16.mxu0 %v10219_v0  ;;  %9935 = vmatprep.subr.bf16.mxu1 %v10219_v0 }
 0x90a   :  { %8525 = vmatmul.mubr.f32.vlgmr.msra.gmra.mrb[50].mxu1 %v4743_v6  ;;  %v11462_v6 = vsub.f32 %v5323_v53, %v5377_v49 }
 0x90b   :  { %9883 = vmatpush3.bf16.msra.mxu0 %v10492_v48  ;;  %9937 = vmatpush3.bf16.msra.mxu1 %v10289_v12  ;;  %v5308_v12 = vld [vmem:[#allocation6] sm:$0xff] }
 0x90c   :  { %9884 = vmatprep.subr.bf16.mxu0 %v10219_v0  ;;  %9938 = vmatprep.subr.bf16.mxu1 %v10219_v0  ;;  %v5316_v48 = vld [vmem:[#allocation6 + $0x40] sm:$0xff] }
 0x90d   :  { %8594 = vmatprep.mubr.msk.f32.mxu1 %vm10220_vm0, %v10221_v1  ;;  %v5356_v29 = vand.u32 4294901760, %v5316_v48 }
 0x90f   :  { %9886 = vmatpush3.bf16.msra.mxu0 %v10498_v50  ;;  %9940 = vmatpush3.bf16.msra.mxu1 %v10292_v13  ;;  %v5309_v13 = vld [vmem:[#allocation6 + $0x8] sm:$0xff]  ;;  %v11440_v55 = vsub.f32 %v5316_v48, %v5356_v29  ;;  %v11695_v48 = vand.u32 4294901760, %v11436_v26 }
 0x910   :  { %9911 = vmatprep.subr.bf16.mxu0 %v10219_v0  ;;  %9941 = vmatprep.subr.bf16.mxu1 %v10219_v0  ;;  %v5317_v50 = vld [vmem:[#allocation6 + $0x48] sm:$0xff] }
 0x911   :  { %v5359_v10 = vand.u32 4294901760, %v5317_v50  ;;  %v11693_v51 = vand.u32 4294901760, %v11440_v55 }
 0x912   :  { %8490 = vmatmul.mubr.f32.vlgmr.msra.gmra.mrb[38].mxu0 %v4742_v3  ;;  %v11460_v3 = vsub.f32 %v5322_v36, %v5374_v46 }
 0x913   :  { %9913 = vmatpush3.bf16.msra.mxu0 %v10379_v16  ;;  %9943 = vmatpush3.bf16.msra.mxu1 %v10298_v18  ;;  %v5332_v18 = vand.u32 4294901760, %v5308_v12  ;;  %v5311_v16 = vld [vmem:[#allocation6 + $0x18] sm:$0xff]  ;;  %v11420_v33 = vpack.c.bf16 %v5359_v10, %v5356_v29  ;;  %v11442_v56 = vsub.f32 %v5317_v50, %v5359_v10  ;;  %v11694_v50 = vand.u32 4294901760, %v11438_v54 }
 0x914   :  { %9914 = vmatprep.subr.bf16.mxu0 %v10219_v0  ;;  %9944 = vmatprep.subr.bf16.mxu1 %v10219_v0  ;;  %v5468_v10 = vsub.f32 %v11436_v26, %v11695_v48  ;;  %v5482_v37 = vsub.f32 %v11440_v55, %v11693_v51 }
 0x915   :  { %8559 = vmatprep.mubr.msk.f32.mxu0 %vm10220_vm0, %v10221_v1  ;;  %v5475_v11 = vsub.f32 %v11438_v54, %v11694_v50  ;;  %v11692_v24 = vand.u32 4294901760, %v11442_v56 }
 0x916   :  { %v5469_v35 = vand.u32 4294901760, %v5468_v10  ;;  %v5483_v36 = vand.u32 4294901760, %v5482_v37  ;;  %v11687_v10 = vand.u32 4294901760, %v11460_v3 }
 0x917   :  { %9916 = vmatpush3.bf16.msra.mxu0 %v10381_v17  ;;  %9946 = vmatpush3.bf16.msra.mxu1 %v10304_v30  ;;  %v5335_v30 = vand.u32 4294901760, %v5309_v13  ;;  %v5476_v14 = vand.u32 4294901760, %v5475_v11  ;;  %v5489_v60 = vsub.f32 %v11442_v56, %v11692_v24  ;;  %v11686_v11 = vand.u32 4294901760, %v11462_v6 }
 0x918   :  { %9917 = vmatprep.subr.bf16.mxu0 %v10219_v0  ;;  %9947 = vmatprep.subr.bf16.mxu1 %v10219_v0 }
 0x919   :  { %v11504_v31 = vpack.c.bf16 %v5476_v14, %v5469_v35  ;;  %v5490_v53 = vand.u32 4294901760, %v5489_v60  ;;  %v5524_v14 = vsub.f32 %v11460_v3, %v11687_v10  ;;  %v5531_v37 = vsub.f32 %v11462_v6, %v11686_v11 }
 0x91a   :  { %v10017_v11 = vpack.c.bf16 %v11438_v54, %v11436_v26 }
 0x91b   :  { %9919 = vmatpush3.bf16.msra.mxu0 %v10383_v19  ;;  %9949 = vmatpush3.bf16.msra.mxu1 %v10316_v41  ;;  %v11400_v41 = vpack.c.bf16 %v5335_v30, %v5332_v18  ;;  %v5341_v19 = vand.u32 4294901760, %v5311_v16  ;;  %v5525_v60 = vand.u32 4294901760, %v5524_v14  ;;  %v10020_v14 = vpack.c.bf16 %v11442_v56, %v11440_v55 }
 0x91c   :  { %9920 = vmatprep.subr.bf16.mxu0 %v10219_v0  ;;  %9950 = vmatprep.subr.bf16.mxu1 %v10219_v0 }
 0x91d   :  { %v11430_v7 = vsub.f32 %v5311_v16, %v5341_v19 }
 0x91f   :  { %9922 = vmatpush3.bf16.msra.mxu0 %v10386_v21  ;;  %9952 = vmatpush3.bf16.msra.mxu1 %v10320_v42  ;;  %v11402_v42 = vsub.f32 %v5308_v12, %v5332_v18  ;;  %v11698_v18 = vand.u32 4294901760, %v11430_v7 }
 0x920   :  { %9923 = vmatprep.subr.bf16.mxu0 %v10219_v0  ;;  %9953 = vmatprep.subr.bf16.mxu1 %v10219_v0 }
 0x921   :  { %v5425_v59 = vand.u32 4294901760, %v11402_v42  ;;  %v5447_v16 = vsub.f32 %v11430_v7, %v11698_v18 }
 0x923   :  { %9925 = vmatpush3.bf16.msra.mxu0 %v10388_v22  ;;  %9955 = vmatpush3.bf16.msra.mxu1 %v10322_v43  ;;  %v11404_v43 = vsub.f32 %v5309_v13, %v5335_v30  ;;  %v5312_v22 = vld [vmem:[#allocation6 + $0x20] sm:$0xff]  ;;  %v5426_v25 = vsub.f32 %v11402_v42, %v5425_v59 }
 0x924   :  { %9926 = vmatprep.subr.bf16.mxu0 %v10219_v0  ;;  %9956 = vmatprep.subr.bf16.mxu1 %v10219_v0 }
 0x925   :  { %v11700_v61 = vand.u32 4294901760, %v11404_v43  ;;  %v5427_v12 = vand.u32 4294901760, %v5426_v25  ;;  %v11514_v25 = vpack.c.bf16 %v5490_v53, %v5483_v36  ;;  %v5532_v36 = vand.u32 4294901760, %v5531_v37 }
 0x926   :  { %v10023_v37 = vpack.c.bf16 %v11446_v58, %v11444_v57 }
 0x927   :  { %9928 = vmatpush3.bf16.msra.mxu0 %v10390_v23  ;;  %9958 = vmatpush3.bf16.msra.mxu1 %v10324_v44  ;;  %v5310_v44 = vld [vmem:[#allocation6 + $0x10] sm:$0xff]  ;;  %v5313_v23 = vld [vmem:[#allocation6 + $0x28] sm:$0xff]  ;;  %v5433_v8 = vsub.f32 %v11404_v43, %v11700_v61  ;;  %v10005_v53 = vpack.c.bf16 %v5532_v36, %v5525_v60  ;;  %v10026_v60 = vpack.c.bf16 %v11452_v45, %v11450_v4 }
 0x928   :  { %9929 = vmatprep.subr.bf16.mxu0 %v10219_v0  ;;  %v5338_v17 = vand.u32 4294901760, %v5310_v44  ;;  %v10029_v36 = vpack.c.bf16 %v11462_v6, %v11460_v3 }
 0x929   :  { %v5434_v30 = vand.u32 4294901760, %v5433_v8 }
 0x92a   :  { %8595 = vmatmul.mubr.f32.vlgmr.msra.gmra.mrb[52].mxu1 %v11321_v63  ;;  %v11408_v21 = vpack.c.bf16 %v5341_v19, %v5338_v17  ;;  %v11428_v2 = vsub.f32 %v5310_v44, %v5338_v17 }
 0x92b   :  { %9931 = vmatpush3.bf16.msra.mxu0 %v10394_v27  ;;  %v5344_v27 = vand.u32 4294901760, %v5312_v22  ;;  %v11480_v17 = vpack.c.bf16 %v5434_v30, %v5427_v12 }
 0x92c   :  { %9932 = vmatprep.subr.bf16.mxu0 %v10219_v0  ;;  %v11699_v13 = vand.u32 4294901760, %v11428_v2 }
 0x92d   :  { %v11432_v9 = vsub.f32 %v5312_v22, %v5344_v27  ;;  %v5448_v22 = vand.u32 4294901760, %v5447_v16  ;;  %v11689_v16 = vand.u32 4294901760, %v11450_v4 }
 0x92e   :  { %v5440_v44 = vsub.f32 %v11428_v2, %v11699_v13 }
 0x92f   :  { %9934 = vmatpush3.bf16.msra.mxu0 %v10398_v28  ;;  %v5347_v28 = vand.u32 4294901760, %v5313_v23 }
 0x930   :  { %9959 = vmatprep.subr.bf16.mxu0 %v10219_v0  ;;  %v5441_v19 = vand.u32 4294901760, %v5440_v44 }
 0x931   :  { %v11412_v15 = vpack.c.bf16 %v5347_v28, %v5344_v27  ;;  %v11434_v34 = vsub.f32 %v5313_v23, %v5347_v28  ;;  %v11697_v23 = vand.u32 4294901760, %v11432_v9 }
 0x932   :  { %8560 = vmatmul.mubr.f32.vlgmr.msra.gmra.mrb[40].mxu0 %v11321_v63  ;;  %v11458_v63 = vpack.c.bf16 %v5377_v49, %v5374_v46  ;;  %v11484_v28 = vpack.c.bf16 %v5448_v22, %v5441_v19  ;;  %v11691_v46 = vand.u32 4294901760, %v11444_v57  ;;  %v11690_v49 = vand.u32 4294901760, %v11446_v58 }
 0x933   :  { %8629 = vmatprep.mubr.msk.f32.mxu0 %vm10220_vm0, %v10221_v1  ;;  %9961 = vmatpush3.bf16.msra.mxu0 %v11400_v41  ;;  %v11696_v27 = vand.u32 4294901760, %v11434_v34  ;;  %v5454_v20 = vsub.f32 %v11432_v9, %v11697_v23  ;;  %v11688_v19 = vand.u32 4294901760, %v11452_v45 }
 0x934   :  { %9962 = vmatprep.subr.bf16.mxu0 %v10219_v0  ;;  %v5496_v8 = vsub.f32 %v11444_v57, %v11691_v46  ;;  %v5503_v12 = vsub.f32 %v11446_v58, %v11690_v49  ;;  %v4656_v46 = vpop.permute.xlu1 %4655 }
 0x935   :  { %v5461_v38 = vsub.f32 %v11434_v34, %v11696_v27  ;;  %v5455_v39 = vand.u32 4294901760, %v5454_v20  ;;  %v5510_v20 = vsub.f32 %v11450_v4, %v11689_v16  ;;  %v4658_v24 = vmul.f32 %v11080_v5, %v4656_v46 }
 0x936   :  { %v5497_v30 = vand.u32 4294901760, %v5496_v8  ;;  %v5504_v44 = vand.u32 4294901760, %v5503_v12  ;;  %v11701_v5 = vand.u32 4294901760, %v11404_v43 }
 0x937   :  { %9964 = vmatpush3.bf16.msra.mxu0 %v11408_v21  ;;  %v5462_v40 = vand.u32 4294901760, %v5461_v38  ;;  %v5517_v38 = vsub.f32 %v11452_v45, %v11688_v19  ;;  %v4659_v27 = vadd.f32 %v11086_v32, %v4658_v24 }
 0x938   :  { %9965 = vmatprep.subr.bf16.mxu0 %v10219_v0  ;;  %v9999_v22 = vpack.c.bf16 %v5504_v44, %v5497_v30  ;;  %v10008_v30 = vpack.c.bf16 %v11404_v43, %v11402_v42  ;;  %v10011_v44 = vpack.c.bf16 %v11430_v7, %v11428_v2  ;;  %v10056_v32 = vpack.c.bf16 %v11701_v5, %v5425_v59 }
 0x939   :  { %v11494_v29 = vpack.c.bf16 %v5462_v40, %v5455_v39  ;;  %v5511_v39 = vand.u32 4294901760, %v5510_v20  ;;  %v5518_v40 = vand.u32 4294901760, %v5517_v38  ;;  %v11704_v42 = vand.u32 4294901760, %v11432_v9 }
 0x93a   :  { %v11705_v43 = vand.u32 4294901760, %v11434_v34 }
 0x93b   :  { %9967 = vmatpush3.bf16.msra.mxu0 %v11412_v15  ;;  %v10002_v35 = vpack.c.bf16 %v5518_v40, %v5511_v39  ;;  %v10014_v40 = vpack.c.bf16 %v11434_v34, %v11432_v9  ;;  %v11710_v9 = vand.u32 4294901760, %v11444_v57  ;;  %v11711_v34 = vand.u32 4294901760, %v11446_v58 }
 0x93c   :  { %9968 = vmatprep.subr.bf16.mxu0 %v10219_v0  ;;  %v10062_v59 = vpack.c.bf16 %v11705_v43, %v11704_v42 }
 0x93f   :  { %9970 = vmatpush3.bf16.msra.mxu0 %v11416_v47 }
 0x940   :  { %9971 = vmatprep.subr.bf16.mxu0 %v10219_v0 }
 0x943   :  { %9973 = vmatpush3.bf16.msra.mxu0 %v11420_v33 }
 0x944   :  { %9974 = vmatprep.subr.bf16.mxu0 %v10219_v0 }
 0x947   :  { %9976 = vmatpush3.bf16.msra.mxu0 %v11424_v52 }
 0x948   :  { %9977 = vmatprep.subr.bf16.mxu0 %v10219_v0 }
 0x94b   :  { %9979 = vmatpush3.bf16.msra.mxu0 %v11448_v62 }
 0x94c   :  { %9980 = vmatprep.subr.bf16.mxu0 %v10219_v0 }
 0x94f   :  { %9982 = vmatpush3.bf16.msra.mxu0 %v11458_v63 }
 0x950   :  { %9983 = vmatprep.subr.bf16.mxu0 %v10219_v0 }
 0x9bd   :  { %v4898_v8 = vpop.f32.mrb[48].mxu1 }
 0x9be   :  { %v8456_v12 = vpop.f32.mrb[49].mxu1 }
 0x9c5   :  { %v4747_v20 = vpop.f32.mrb[36].mxu0 }
 0x9c6   :  { %v4899_v38 = vadd.f32 %v4898_v8, %v4747_v20  ;;  %v8421_v39 = vpop.f32.mrb[37].mxu0 }
 0x9dd   :  { %v5091_v8 = vpop.f32.mrb[50].mxu1 }
 0x9de   :  { %v8526_v12 = vpop.f32.mrb[51].mxu1 }
 0x9e5   :  { %v5002_v20 = vpop.f32.mrb[38].mxu0 }
 0x9e6   :  { %v5003_v39 = vadd.f32 %v5002_v20, %v4899_v38  ;;  %v8491_v10 = vpop.f32.mrb[39].mxu0 }
 0x9e8   :  { %v5092_v19 = vadd.f32 %v5091_v8, %v5003_v39 }
 0x9fd   :  { %v5297_v16 = vpop.f32.mrb[52].mxu1 }
 0x9fe   :  { %v8596_v49 = vpop.f32.mrb[53].mxu1 }
 0xa05   :  { %v5210_v51 = vpop.f32.mrb[40].mxu0 }
 0xa06   :  { %v5211_v50 = vadd.f32 %v5210_v51, %v5092_v19  ;;  %v8561_v48 = vpop.f32.mrb[41].mxu0 }
 0xa08   :  { %v5298_v23 = vadd.f32 %v5297_v16, %v5211_v50  ;;  %v10071_v50 = vpack.c.bf16 %v11711_v34, %v11710_v9 }
 0xa0a   :  { %v5301_v18 = vadd.f32 %v5298_v23, %v4659_v27  ;;  %v11706_v23 = vand.u32 4294901760, %v11436_v26  ;;  %v11708_v27 = vand.u32 4294901760, %v11440_v55  ;;  %v11712_v26 = vand.u32 4294901760, %v11450_v4 }
 0xa0b   :  { %v11714_v55 = vand.u32 4294901760, %v11460_v3 }
 0xa0c   :  { %10139 = vtanh.f32 %v5301_v18  ;;  %v11703_v18 = vand.u32 4294901760, %v11430_v7 }
 0xa16   :  { %v10140_v13 = vpop.eup %10139 }
 0xa17   :  { %v11556_v61 = vand.u32 4294901760, %v10140_v13 }
 0xa19   :  { %v5413_v38 = vsub.f32 %v10140_v13, %v11556_v61  ;;  %v11702_v13 = vand.u32 4294901760, %v11428_v2  ;;  %v11707_v2 = vand.u32 4294901760, %v11438_v54  ;;  %v11713_v54 = vand.u32 4294901760, %v11452_v45 }
 0xa1b   :  { %v5414_v10 = vand.u32 4294901760, %v5413_v38  ;;  %v10065_v7 = vpack.c.bf16 %v11707_v2, %v11706_v23 }
 0xa1d   :  { %v5415_v8 = vsub.f32 %v5413_v38, %v5414_v10 }
 0xa1f   :  { %v5416_v12 = vand.u32 4294901760, %v5415_v8 }
 0xa21   :  { %8630 = vmatmul.mubr.f32.vlgmr.msra.gmra.mrb[42].mxu0 %v5416_v12 }
 0xa22   :  { %9985 = vmatpush3.bf16.msra.mxu0 %v11480_v17  ;;  %8664 = vmatprep.mubr.msk.f32.mxu0 %vm10220_vm0, %v10221_v1  ;;  %v10059_v17 = vpack.c.bf16 %v11703_v18, %v11702_v13 }
 0xa23   :  { %9986 = vmatprep.subr.bf16.mxu0 %v10219_v0 }
 0xa26   :  { %9988 = vmatpush3.bf16.msra.mxu0 %v11484_v28  ;;  %v11709_v28 = vand.u32 4294901760, %v11442_v56  ;;  %v11715_v56 = vand.u32 4294901760, %v11462_v6 }
 0xa27   :  { %9989 = vmatprep.subr.bf16.mxu0 %v10219_v0 }
 0xa28   :  { %v10068_v48 = vpack.c.bf16 %v11709_v28, %v11708_v27  ;;  %v10077_v51 = vpack.c.bf16 %v11715_v56, %v11714_v55 }
 0xa2a   :  { %9991 = vmatpush3.bf16.msra.mxu0 %v11494_v29  ;;  %v10074_v29 = vpack.c.bf16 %v11713_v54, %v11712_v26 }
 0xa2b   :  { %9992 = vmatprep.subr.bf16.mxu0 %v10219_v0 }
 0xa2e   :  { %9994 = vmatpush3.bf16.msra.mxu0 %v11504_v31 }
 0xa2f   :  { %9995 = vmatprep.subr.bf16.mxu0 %v10219_v0 }
 0xa32   :  { %9997 = vmatpush3.bf16.msra.mxu0 %v11514_v25 }
 0xa33   :  { %9998 = vmatprep.subr.bf16.mxu0 %v10219_v0 }
 0xa36   :  { %10000 = vmatpush3.bf16.msra.mxu0 %v9999_v22 }
 0xa37   :  { %10001 = vmatprep.subr.bf16.mxu0 %v10219_v0 }
 0xa3a   :  { %10003 = vmatpush3.bf16.msra.mxu0 %v10002_v35 }
 0xa3b   :  { %10004 = vmatprep.subr.bf16.mxu0 %v10219_v0 }
 0xa3e   :  { %10006 = vmatpush3.bf16.msra.mxu0 %v10005_v53 }
 0xa3f   :  { %10007 = vmatprep.subr.bf16.mxu0 %v10219_v0 }
 0xa41   :  { %8665 = vmatmul.mubr.f32.vlgmr.msra.gmra.mrb[42].mxu0 %v11556_v61 }
 0xa42   :  { %10009 = vmatpush3.bf16.msra.mxu0 %v10008_v30  ;;  %8699 = vmatprep.mubr.msk.f32.mxu0 %vm10220_vm0, %v10221_v1 }
 0xa43   :  { %10010 = vmatprep.subr.bf16.mxu0 %v10219_v0 }
 0xa46   :  { %10012 = vmatpush3.bf16.msra.mxu0 %v10011_v44 }
 0xa47   :  { %10013 = vmatprep.subr.bf16.mxu0 %v10219_v0 }
 0xa4a   :  { %10015 = vmatpush3.bf16.msra.mxu0 %v10014_v40 }
 0xa4b   :  { %10016 = vmatprep.subr.bf16.mxu0 %v10219_v0 }
 0xa4e   :  { %10018 = vmatpush3.bf16.msra.mxu0 %v10017_v11 }
 0xa4f   :  { %10019 = vmatprep.subr.bf16.mxu0 %v10219_v0 }
 0xa52   :  { %10021 = vmatpush3.bf16.msra.mxu0 %v10020_v14 }
 0xa53   :  { %10022 = vmatprep.subr.bf16.mxu0 %v10219_v0 }
 0xa56   :  { %10024 = vmatpush3.bf16.msra.mxu0 %v10023_v37 }
 0xa57   :  { %10025 = vmatprep.subr.bf16.mxu0 %v10219_v0 }
 0xa5a   :  { %10027 = vmatpush3.bf16.msra.mxu0 %v10026_v60 }
 0xa5b   :  { %10028 = vmatprep.subr.bf16.mxu0 %v10219_v0 }
 0xa5e   :  { %10030 = vmatpush3.bf16.msra.mxu0 %v10029_v36 }
 0xa5f   :  { %10031 = vmatprep.subr.bf16.mxu0 %v10219_v0 }
 0xa61   :  { %8700 = vmatmul.mubr.f32.vlgmr.msra.gmra.mrb[42].mxu0 %v5413_v38 }
 0xa62   :  { %10033 = vmatpush3.bf16.msra.mxu0 %v11400_v41  ;;  %8734 = vmatprep.mubr.msk.f32.mxu0 %vm10220_vm0, %v10221_v1 }
 0xa63   :  { %10034 = vmatprep.subr.bf16.mxu0 %v10219_v0 }
 0xa66   :  { %10036 = vmatpush3.bf16.msra.mxu0 %v11408_v21 }
 0xa67   :  { %10037 = vmatprep.subr.bf16.mxu0 %v10219_v0 }
 0xa6a   :  { %10039 = vmatpush3.bf16.msra.mxu0 %v11412_v15 }
 0xa6b   :  { %10040 = vmatprep.subr.bf16.mxu0 %v10219_v0 }
 0xa6e   :  { %10042 = vmatpush3.bf16.msra.mxu0 %v11416_v47 }
 0xa6f   :  { %10043 = vmatprep.subr.bf16.mxu0 %v10219_v0 }
 0xa72   :  { %10045 = vmatpush3.bf16.msra.mxu0 %v11420_v33 }
 0xa73   :  { %10046 = vmatprep.subr.bf16.mxu0 %v10219_v0 }
 0xa76   :  { %10048 = vmatpush3.bf16.msra.mxu0 %v11424_v52 }
 0xa77   :  { %10049 = vmatprep.subr.bf16.mxu0 %v10219_v0 }
 0xa7a   :  { %10051 = vmatpush3.bf16.msra.mxu0 %v11448_v62 }
 0xa7b   :  { %10052 = vmatprep.subr.bf16.mxu0 %v10219_v0 }
 0xa7e   :  { %10054 = vmatpush3.bf16.msra.mxu0 %v11458_v63 }
 0xa7f   :  { %10055 = vmatprep.subr.bf16.mxu0 %v10219_v0 }
 0xa81   :  { %8735 = vmatmul.mubr.f32.vlgmr.msra.gmra.mrb[42].mxu0 %v5414_v10 }
 0xa82   :  { %10057 = vmatpush3.bf16.msra.mxu0 %v10056_v32  ;;  %8769 = vmatprep.mubr.msk.f32.mxu0 %vm10220_vm0, %v10221_v1 }
 0xa83   :  { %10058 = vmatprep.subr.bf16.mxu0 %v10219_v0 }
 0xa86   :  { %10060 = vmatpush3.bf16.msra.mxu0 %v10059_v17 }
 0xa87   :  { %10061 = vmatprep.subr.bf16.mxu0 %v10219_v0 }
 0xa8a   :  { %10063 = vmatpush3.bf16.msra.mxu0 %v10062_v59 }
 0xa8b   :  { %10064 = vmatprep.subr.bf16.mxu0 %v10219_v0 }
 0xa8e   :  { %10066 = vmatpush3.bf16.msra.mxu0 %v10065_v7 }
 0xa8f   :  { %10067 = vmatprep.subr.bf16.mxu0 %v10219_v0 }
 0xa92   :  { %10069 = vmatpush3.bf16.msra.mxu0 %v10068_v48 }
 0xa93   :  { %10070 = vmatprep.subr.bf16.mxu0 %v10219_v0 }
 0xa96   :  { %10072 = vmatpush3.bf16.msra.mxu0 %v10071_v50 }
 0xa97   :  { %10073 = vmatprep.subr.bf16.mxu0 %v10219_v0 }
 0xa9a   :  { %10075 = vmatpush3.bf16.msra.mxu0 %v10074_v29 }
 0xa9b   :  { %10076 = vmatprep.subr.bf16.mxu0 %v10219_v0 }
 0xa9e   :  { %10078 = vmatpush3.bf16.msra.mxu0 %v10077_v51 }
 0xa9f   :  { %10079 = vmatprep.subr.bf16.mxu0 %v10219_v0 }
 0xaa1   :  { %8770 = vmatmul.mubr.f32.vlgmr.msra.gmra.mrb[42].mxu0 %v11556_v61 }
 0xaa2   :  { %10081 = vmatpush3.bf16.msra.mxu0 %v11400_v41  ;;  %8804 = vmatprep.mubr.msk.f32.mxu0 %vm10220_vm0, %v10221_v1  ;;  %v5998_v1 = vld [vmem:[%s11684_s5] ss:$0 sm:$0xff] }
 0xaa3   :  { %10082 = vmatprep.subr.bf16.mxu0 %v10219_v0 }
 0xaa6   :  { %10084 = vmatpush3.bf16.msra.mxu0 %v11408_v21 }
 0xaa7   :  { %10085 = vmatprep.subr.bf16.mxu0 %v10219_v0 }
 0xaaa   :  { %10087 = vmatpush3.bf16.msra.mxu0 %v11412_v15 }
 0xaab   :  { %10088 = vmatprep.subr.bf16.mxu0 %v10219_v0 }
 0xaae   :  { %10090 = vmatpush3.bf16.msra.mxu0 %v11416_v47 }
 0xaaf   :  { %10091 = vmatprep.subr.bf16.mxu0 %v10219_v0 }
 0xab2   :  { %10093 = vmatpush3.bf16.msra.mxu0 %v11420_v33 }
 0xab3   :  { %10094 = vmatprep.subr.bf16.mxu0 %v10219_v0 }
 0xab6   :  { %10096 = vmatpush3.bf16.msra.mxu0 %v11424_v52 }
 0xab7   :  { %10097 = vmatprep.subr.bf16.mxu0 %v10219_v0 }
 0xaba   :  { %10099 = vmatpush3.bf16.msra.mxu0 %v11448_v62 }
 0xabb   :  { %10100 = vmatprep.subr.bf16.mxu0 %v10219_v0 }
 0xabe   :  { %10102 = vmatpush3.bf16.msra.mxu0 %v11458_v63 }
 0xac1   :  { %8805 = vmatmul.mubr.f32.vlgmr.msra.gmra.mrb[42].mxu0 %v11556_v61 }
 0xb94   :  { %v5968_v41 = vpop.f32.mrb[42].mxu0 }
 0xb95   :  { %v10103_v21 = vadd.f32 %v5998_v1, %v5968_v41  ;;  %v8806_v15 = vpop.f32.mrb[43].mxu0 }
 0xb97   :  { %5972 = vst [vmem:[#allocation8] sm:$0xff] %v10103_v21 }
 0xb98   :  { %10198 = shalt.err (!%p10195_p6)
}
 0xb99   :  { %s10199_s23 = scalar_lea.hbm %s11685_s6, 128 }
 0xb9a   :  { %p10200_p7 = scmp.ne.s32.totalorder %s11685_s6, %s10199_s23  ;;  %p10203_p8 = scmp.lt.u32.totalorder %s10199_s23, %s11685_s6 }
 0xb9c   :  { %p10205_p9 = pnand %p10203_p8, %p10200_p7 }
 0xb9e   :  { %10208 = shalt.err (!%p10205_p9)
}
 0xb9f   :  { %5982 = dma.vmem_to_hbm [thread:$0]  %s5980_s3, 128, %s11685_s6, [#allocation5]  }
 0xba0   :  { %10213 = dma.done.wait [#allocation5], 128  }
 0xba1   :  { %10214 = vsyncadd [#allocation5], 4294967168 }
 0xba2   :  { %5986 = vsyncpa [#allocation4], 1 }
 0xba3   :  { %5987 = vsyncpa [#allocation7], 1 }
 0xba4   :  { %5988 = vsyncpa [#allocation5], 1 }

</bundles_post_ra>
